<compile_context>
chip_gen: v6e
topology: v6e:2x2x1
jax: 0.10.0
libtpu: 0.0.40
codegen_flags: <defaults>
</compile_context>

<pallas_src>
import functools

import jax
import jax.numpy as jnp
from jax.experimental import pallas as pl
from jax.experimental.pallas import tpu as pltpu


def autoencoder_kernel(x_ref,
                       w1_ref, b1_ref,
                       w23_ref, b23_ref,
                       w4_ref, b4_ref,
                       out_ref):
    # In-kernel downcast: x is read from HBM as f32 exactly once, cast in VMEM.
    x = x_ref[...].astype(jnp.bfloat16)                                # (TILE_B, D_in)

    # ----- encoder L1 + ReLU (bf16 MXU, f32 accumulate, f32 epilogue) -----
    h1 = jnp.dot(x, w1_ref[...], preferred_element_type=jnp.float32) + b1_ref[...]
    h1 = jnp.maximum(h1, 0.0)

    # ----- fused encoder-L2 @ decoder-L1 (no nonlinearity between them) + ReLU -----
    h2 = jnp.dot(h1.astype(jnp.bfloat16), w23_ref[...],
                 preferred_element_type=jnp.float32) + b23_ref[...]
    h2 = jnp.maximum(h2, 0.0)

    # ----- decoder L2 + sigmoid (exp on EUP, approx reciprocal keeps div off VALU) -----
    y = jnp.dot(h2.astype(jnp.bfloat16), w4_ref[...],
                preferred_element_type=jnp.float32) + b4_ref[...]
    sig = pl.reciprocal(1.0 + jnp.exp(-y), approx=True)
    out_ref[...] = sig.astype(out_ref.dtype)


def _round_up(a, m):
    return (a + m - 1) // m * m


@functools.partial(jax.jit, static_argnames=("tile_b",))
def autoencoder_forward(x, params, *, tile_b=1024):
    """Fused autoencoder forward pass: one pallas_call, batch-tiled grid."""
    w1, b1, w2, b2, w3, b3, w4, b4 = params
    B, D_in = x.shape
    H = w1.shape[1]

    # Fold the activation-free latent bottleneck (tiny, done once in f32).
    w23 = (w2 @ w3).astype(jnp.bfloat16)                 # (H, H)
    b23 = (b2 @ w3 + b3).astype(jnp.float32)             # (1, H)

    w1b = w1.astype(jnp.bfloat16)
    w4b = w4.astype(jnp.bfloat16)
    b1f = b1.astype(jnp.float32)
    b4f = b4.astype(jnp.float32)

    # Batch tile: large enough to amortize per-step overhead, clamped for small B.
    # Must be a multiple of 8 (sublane); D_in (=lanes) is a multiple of 128.
    tile = min(tile_b, _round_up(B, 8))
    n_tiles = pl.cdiv(B, tile)   # ragged last tile handled by Pallas clipping

    # Weights/biases: constant index_map -> fetched once, VMEM-resident across the grid.
    resident = lambda arr: pl.BlockSpec(arr.shape, lambda i: (0, 0))

    flops = 2 * B * (D_in * H + H * H + H * D_in)
    bytes_accessed = (2 * B * D_in) * 4 \
        + (w1b.size + w23.size + w4b.size) * 2 \
        + (b1f.size + b23.size + b4f.size) * 4
    cost = pl.CostEstimate(flops=flops,
                           transcendentals=B * D_in,
                           bytes_accessed=bytes_accessed)

    out = pl.pallas_call(
        autoencoder_kernel,
        out_shape=jax.ShapeDtypeStruct((B, D_in), x.dtype),
        grid=(n_tiles,),
        in_specs=[
            pl.BlockSpec((tile, D_in), lambda i: (i, 0)),   # x: batch-tiled
            resident(w1b), resident(b1f),
            resident(w23), resident(b23),
            resident(w4b), resident(b4f),
        ],
        out_specs=pl.BlockSpec((tile, D_in), lambda i: (i, 0)),
        compiler_params=pltpu.CompilerParams(
            dimension_semantics=("parallel",)),             # megacore sharding on v7x
        cost_estimate=cost,
    )(x, w1b, b1f, w23, b23, w4b, b4f)

    return out


def init_params(key, d_in, hidden, latent):
    """Deterministic, PyTorch-Linear-style uniform(+-1/sqrt(fan_in)) init (f32)."""
    def linear(k, fan_in, fan_out):
        kw, kb = jax.random.split(k)
        bound = 1.0 / jnp.sqrt(fan_in)
        w = jax.random.uniform(kw, (fan_in, fan_out), jnp.float32, -bound, bound)
        b = jax.random.uniform(kb, (1, fan_out), jnp.float32, -bound, bound)
        return w, b

    k1, k2, k3, k4 = jax.random.split(key, 4)
    w1, b1 = linear(k1, d_in, hidden)     # encoder L1
    w2, b2 = linear(k2, hidden, latent)   # encoder L2
    w3, b3 = linear(k3, latent, hidden)   # decoder L1
    w4, b4 = linear(k4, hidden, d_in)     # decoder L2
    return (w1, b1, w2, b2, w3, b3, w4, b4)


def reference_forward(x, params):
    """Pure-JAX f32 reference (unfused) for correctness checking."""
    w1, b1, w2, b2, w3, b3, w4, b4 = params
    h1 = jnp.maximum(x @ w1 + b1, 0.0)
    z = h1 @ w2 + b2
    h2 = jnp.maximum(z @ w3 + b3, 0.0)
    return jax.nn.sigmoid(h2 @ w4 + b4)


if __name__ == "__main__":
    # Small MNIST-like shapes: 16x16 "images" flattened to 256.
    B, D_IN, HIDDEN, LATENT = 200, 256, 128, 32

    key = jax.random.PRNGKey(0)
    kx, kp = jax.random.split(key)
    x = jax.random.uniform(kx, (B, D_IN), jnp.float32)   # pixel values in [0, 1)
    params = init_params(kp, D_IN, HIDDEN, LATENT)

    ref = reference_forward(x, params)

    # Default (large-tile) path: single tile of round_up(200, 8)=208 rows, clipped write.
    out = jax.block_until_ready(autoencoder_forward(x, params))
    assert out.shape == (B, D_IN) and out.dtype == jnp.float32
    # bf16 matmul inputs + fused w2@w3 + approx reciprocal change low-order bits.
    assert jnp.allclose(out, ref, atol=2e-2, rtol=2e-2), "mismatch vs JAX reference"

    # Multi-tile path (4 grid steps incl. ragged last tile) to exercise the pipeline.
    out2 = jax.block_until_ready(autoencoder_forward(x, params, tile_b=64))
    assert jnp.allclose(out2, ref, atol=2e-2, rtol=2e-2), "mismatch (tiled) vs reference"

    print("KERNEL_OK")
</pallas_src>

<mosaic_0001>
module attributes {stable_mosaic.version = 11 : i64} {
  func.func @autoencoder_kernel(%arg0: i32, %arg1: memref<200x256xf32, #tpu.memory_space<vmem>>, %arg2: memref<256x128xbf16, #tpu.memory_space<vmem>>, %arg3: memref<1x128xf32, #tpu.memory_space<vmem>>, %arg4: memref<128x128xbf16, #tpu.memory_space<vmem>>, %arg5: memref<1x128xf32, #tpu.memory_space<vmem>>, %arg6: memref<128x256xbf16, #tpu.memory_space<vmem>>, %arg7: memref<1x256xf32, #tpu.memory_space<vmem>>, %arg8: memref<200x256xf32, #tpu.memory_space<vmem>>) attributes {dimension_semantics = [#tpu.dimension_semantics<parallel>], iteration_bounds = array<i64: 1>, scalar_prefetch = 0 : i64, scratch_operands = 0 : i64, tpu.core_type = #tpu.core_type<tc>, window_params = [{transform_indices = @transform_0, window_bounds = array<i64: 200, 256>}, {pipeline_mode = #tpu.pipeline_mode<synchronous>, transform_indices = @transform_1, window_bounds = array<i64: 256, 128>}, {pipeline_mode = #tpu.pipeline_mode<synchronous>, transform_indices = @transform_2, window_bounds = array<i64: 1, 128>}, {pipeline_mode = #tpu.pipeline_mode<synchronous>, transform_indices = @transform_3, window_bounds = array<i64: 128, 128>}, {pipeline_mode = #tpu.pipeline_mode<synchronous>, transform_indices = @transform_4, window_bounds = array<i64: 1, 128>}, {pipeline_mode = #tpu.pipeline_mode<synchronous>, transform_indices = @transform_5, window_bounds = array<i64: 128, 256>}, {pipeline_mode = #tpu.pipeline_mode<synchronous>, transform_indices = @transform_6, window_bounds = array<i64: 1, 256>}, {transform_indices = @transform_7, window_bounds = array<i64: 200, 256>}]} {
    %c0 = arith.constant 0 : index
    %c0_0 = arith.constant 0 : index
    %0 = vector.load %arg1[%c0, %c0_0] : memref<200x256xf32, #tpu.memory_space<vmem>>, vector<200x256xf32>
    %1 = arith.truncf %0 : vector<200x256xf32> to vector<200x256xbf16>
    %c0_1 = arith.constant 0 : index
    %c0_2 = arith.constant 0 : index
    %2 = vector.load %arg2[%c0_1, %c0_2] : memref<256x128xbf16, #tpu.memory_space<vmem>>, vector<256x128xbf16>
    %cst = arith.constant dense<0.000000e+00> : vector<200x128xf32>
    %3 = tpu.matmul %1, %2, %cst {dimension_numbers = #tpu.dot_dimension_numbers<[1], [0], [0], [1], [0, 0, 1, 1], [], []>} : vector<200x256xbf16>, vector<256x128xbf16>, vector<200x128xf32> -> vector<200x128xf32>
    %c0_3 = arith.constant 0 : index
    %c0_4 = arith.constant 0 : index
    %4 = vector.load %arg3[%c0_3, %c0_4] : memref<1x128xf32, #tpu.memory_space<vmem>>, vector<1x128xf32>
    %5 = vector.broadcast %4 : vector<1x128xf32> to vector<200x128xf32>
    %6 = arith.addf %3, %5 : vector<200x128xf32>
    %cst_5 = arith.constant 0.000000e+00 : f32
    %7 = vector.broadcast %cst_5 : f32 to vector<200x128xf32>
    %8 = arith.maximumf %6, %7 : vector<200x128xf32>
    %9 = arith.truncf %8 : vector<200x128xf32> to vector<200x128xbf16>
    %c0_6 = arith.constant 0 : index
    %c0_7 = arith.constant 0 : index
    %10 = vector.load %arg4[%c0_6, %c0_7] : memref<128x128xbf16, #tpu.memory_space<vmem>>, vector<128x128xbf16>
    %cst_8 = arith.constant dense<0.000000e+00> : vector<200x128xf32>
    %11 = tpu.matmul %9, %10, %cst_8 {dimension_numbers = #tpu.dot_dimension_numbers<[1], [0], [0], [1], [0, 0, 1, 1], [], []>} : vector<200x128xbf16>, vector<128x128xbf16>, vector<200x128xf32> -> vector<200x128xf32>
    %c0_9 = arith.constant 0 : index
    %c0_10 = arith.constant 0 : index
    %12 = vector.load %arg5[%c0_9, %c0_10] : memref<1x128xf32, #tpu.memory_space<vmem>>, vector<1x128xf32>
    %13 = vector.broadcast %12 : vector<1x128xf32> to vector<200x128xf32>
    %14 = arith.addf %11, %13 : vector<200x128xf32>
    %cst_11 = arith.constant 0.000000e+00 : f32
    %15 = vector.broadcast %cst_11 : f32 to vector<200x128xf32>
    %16 = arith.maximumf %14, %15 : vector<200x128xf32>
    %17 = arith.truncf %16 : vector<200x128xf32> to vector<200x128xbf16>
    %c0_12 = arith.constant 0 : index
    %c0_13 = arith.constant 0 : index
    %18 = vector.load %arg6[%c0_12, %c0_13] : memref<128x256xbf16, #tpu.memory_space<vmem>>, vector<128x256xbf16>
    %cst_14 = arith.constant dense<0.000000e+00> : vector<200x256xf32>
    %19 = tpu.matmul %17, %18, %cst_14 {dimension_numbers = #tpu.dot_dimension_numbers<[1], [0], [0], [1], [0, 0, 1, 1], [], []>} : vector<200x128xbf16>, vector<128x256xbf16>, vector<200x256xf32> -> vector<200x256xf32>
    %c0_15 = arith.constant 0 : index
    %c0_16 = arith.constant 0 : index
    %20 = vector.load %arg7[%c0_15, %c0_16] : memref<1x256xf32, #tpu.memory_space<vmem>>, vector<1x256xf32>
    %21 = vector.broadcast %20 : vector<1x256xf32> to vector<200x256xf32>
    %22 = arith.addf %19, %21 : vector<200x256xf32>
    %cst_17 = arith.constant 0.000000e+00 : f32
    %23 = vector.broadcast %cst_17 : f32 to vector<200x256xf32>
    %24 = arith.subf %23, %22 : vector<200x256xf32>
    %25 = math.exp %24 : vector<200x256xf32>
    %cst_18 = arith.constant 1.000000e+00 : f32
    %26 = vector.broadcast %cst_18 : f32 to vector<200x256xf32>
    %27 = arith.addf %26, %25 : vector<200x256xf32>
    %28 = tpu.reciprocal %27 {approx = true} : vector<200x256xf32> -> vector<200x256xf32>
    %c0_19 = arith.constant 0 : index
    %c0_20 = arith.constant 0 : index
    %29 = vector.load %arg8[%c0_19, %c0_20] : memref<200x256xf32, #tpu.memory_space<vmem>>, vector<200x256xf32>
    tpu.vector_store %arg8[%c0_19, %c0_20], %28 {strides = array<i32>} : memref<200x256xf32, #tpu.memory_space<vmem>>, vector<200x256xf32>,
    return
  }
  func.func @transform_0(%arg0: i32) -> (i32, i32) {
    %c0_i32 = arith.constant 0 : i32
    %c0_i32_0 = arith.constant 0 : i32
    return %arg0, %c0_i32 : i32, i32
  }
  func.func @transform_1(%arg0: i32) -> (i32, i32) {
    %c0_i32 = arith.constant 0 : i32
    %c0_i32_0 = arith.constant 0 : i32
    %c0_i32_1 = arith.constant 0 : i32
    return %c0_i32, %c0_i32_0 : i32, i32
  }
  func.func @transform_2(%arg0: i32) -> (i32, i32) {
    %c0_i32 = arith.constant 0 : i32
    %c0_i32_0 = arith.constant 0 : i32
    %c0_i32_1 = arith.constant 0 : i32
    return %c0_i32, %c0_i32_0 : i32, i32
  }
  func.func @transform_3(%arg0: i32) -> (i32, i32) {
    %c0_i32 = arith.constant 0 : i32
    %c0_i32_0 = arith.constant 0 : i32
    %c0_i32_1 = arith.constant 0 : i32
    return %c0_i32, %c0_i32_0 : i32, i32
  }
  func.func @transform_4(%arg0: i32) -> (i32, i32) {
    %c0_i32 = arith.constant 0 : i32
    %c0_i32_0 = arith.constant 0 : i32
    %c0_i32_1 = arith.constant 0 : i32
    return %c0_i32, %c0_i32_0 : i32, i32
  }
  func.func @transform_5(%arg0: i32) -> (i32, i32) {
    %c0_i32 = arith.constant 0 : i32
    %c0_i32_0 = arith.constant 0 : i32
    %c0_i32_1 = arith.constant 0 : i32
    return %c0_i32, %c0_i32_0 : i32, i32
  }
  func.func @transform_6(%arg0: i32) -> (i32, i32) {
    %c0_i32 = arith.constant 0 : i32
    %c0_i32_0 = arith.constant 0 : i32
    %c0_i32_1 = arith.constant 0 : i32
    return %c0_i32, %c0_i32_0 : i32, i32
  }
  func.func @transform_7(%arg0: i32) -> (i32, i32) {
    %c0_i32 = arith.constant 0 : i32
    %c0_i32_0 = arith.constant 0 : i32
    return %arg0, %c0_i32 : i32, i32
  }
}

</mosaic_0001>

<bundles_post_ra>
// kernel: autoencoder_forward.1
= control target key start
LH: loop header
LB: loop body
LE: loop exit
PB: predicated region body
PF: predicated region fallthrough
CT: control target
= control target key end

     0   :  { %v1760_v36 = vmov 0.0   ;;  %s2309_s0 = inlined_call_operand.vmem [shape: f32[200,256], index: 0, kind: input, shape index: {}]   ;;  %s2310_s1 = inlined_call_operand.vmem [shape: bf16[256,128], index: 1, kind: input, shape index: {}]   ;;  %s2311_s2 = inlined_call_operand.vmem [shape: f32[1,128], index: 2, kind: input, shape index: {}]   ;;  %s2312_s3 = inlined_call_operand.vmem [shape: bf16[128,128], index: 3, kind: input, shape index: {}]   ;;  %s2313_s4 = inlined_call_operand.vmem [shape: f32[1,128], index: 4, kind: input, shape index: {}]   ;;  %s2314_s5 = inlined_call_operand.vmem [shape: bf16[128,256], index: 5, kind: input, shape index: {}]   ;;  %s2315_s6 = inlined_call_operand.vmem [shape: f32[1,256], index: 6, kind: input, shape index: {}]   ;;  %s2316_s7 = inlined_call_operand.hbm [shape: f32[200,256], index: 7, kind: output, shape index: {}]  }
   0x1   :  { %v1490_v0 = vld [vmem:[%s2310_s1 + $0x78] sm:$0xff]   ;;  %v1492_v2 = vld [vmem:[%s2310_s1 + $0x70] sm:$0xff]   ;;  %v1494_v4 = vld [vmem:[%s2310_s1 + $0x68] sm:$0xff]  }
   0x2   :  { %v1491_v1 = vld [vmem:[%s2310_s1 + $0x38] sm:$0xff]   ;;  %1285 = vmatprep.subr.bf16.mxu0 %v1490_v0  ;;  %1468 = vmatprep.subr.bf16.mxu1 %v1490_v0  ;;  %v1493_v3 = vld [vmem:[%s2310_s1 + $0x30] sm:$0xff]   ;;  %v1495_v5 = vld [vmem:[%s2310_s1 + $0x28] sm:$0xff]  }
   0x3   :  { %1286 = vmatpush3.bf16.msra.mxu0 %v1491_v1  ;;  %1476 = vmatpush3.bf16.msra.mxu1 %v1491_v1  ;;  %v1496_v6 = vld [vmem:[%s2310_s1 + $0x60] sm:$0xff]   ;;  %v1498_v8 = vld [vmem:[%s2310_s1 + $0x58] sm:$0xff]   ;;  %v1500_v10 = vld [vmem:[%s2310_s1 + $0x50] sm:$0xff]  }
   0x4   :  { %1287 = vmatprep.subr.bf16.mxu0 %v1492_v2  ;;  %1469 = vmatprep.subr.bf16.mxu1 %v1492_v2  ;;  %v1497_v7 = vld [vmem:[%s2310_s1 + $0x20] sm:$0xff]   ;;  %v1499_v9 = vld [vmem:[%s2310_s1 + $0x18] sm:$0xff]   ;;  %v29_v11 = vld [vmem:[%s2309_s0 + $0x8] sm:$0xff] }
   0x5   :  { %v31_v12 = vld [vmem:[%s2309_s0 + $0x18] sm:$0xff]  ;;  %v1501_v14 = vld [vmem:[%s2310_s1 + $0x10] sm:$0xff]   ;;  %v1502_v15 = vld [vmem:[%s2310_s1 + $0x48] sm:$0xff]  }
   0x6   :  { %v79_v13 = vpack.c.bf16 %v31_v12, %v29_v11  ;;  %v1503_v16 = vld [vmem:[%s2310_s1 + $0x8] sm:$0xff]   ;;  %v1504_v17 = vld [vmem:[%s2310_s1 + $0x40] sm:$0xff]   ;;  %v59_v19 = vld [vmem:[%s2309_s0 + $0xf8] sm:$0xff] }
   0x7   :  { %1288 = vmatpush3.bf16.msra.mxu0 %v1493_v3  ;;  %1477 = vmatpush3.bf16.msra.mxu1 %v1493_v3  ;;  %v57_v18 = vld [vmem:[%s2309_s0 + $0xe8] sm:$0xff]  ;;  %v1505_v20 = vld [vmem:[%s2310_s1] sm:$0xff]   ;;  %v30_v23 = vld [vmem:[%s2309_s0 + $0x10] sm:$0xff] }
   0x8   :  { %1289 = vmatprep.subr.bf16.mxu0 %v1494_v4  ;;  %1470 = vmatprep.subr.bf16.mxu1 %v1494_v4  ;;  %v93_v21 = vpack.c.bf16 %v59_v19, %v57_v18  ;;  %v28_v22 = vld [vmem:[%s2309_s0] sm:$0xff]  ;;  %v33_v24 = vld [vmem:[%s2309_s0 + $0x28] sm:$0xff]  ;;  %v35_v25 = vld [vmem:[%s2309_s0 + $0x38] sm:$0xff] }
   0x9   :  { %271 = vmatprep.mubr.bf16.mxu0 %v79_v13  ;;  %v56_v26 = vld [vmem:[%s2309_s0 + $0xe0] sm:$0xff]  ;;  %v58_v27 = vld [vmem:[%s2309_s0 + $0xf0] sm:$0xff]  ;;  %v61_v28 = vld [vmem:[%s2309_s0 + $0x108] sm:$0xff]  ;;  %v78_v30 = vpack.c.bf16 %v30_v23, %v28_v22  ;;  %v81_v31 = vpack.c.bf16 %v35_v25, %v33_v24 }
   0xa   :  { %327 = vmatprep.mubr.bf16.mxu1 %v93_v21  ;;  %v63_v29 = vld [vmem:[%s2309_s0 + $0x118] sm:$0xff]  ;;  %v92_v32 = vpack.c.bf16 %v58_v27, %v56_v26  ;;  %v32_v34 = vld [vmem:[%s2309_s0 + $0x20] sm:$0xff]  ;;  %v34_v35 = vld [vmem:[%s2309_s0 + $0x30] sm:$0xff] }
   0xb   :  { %1290 = vmatpush3.bf16.msra.mxu0 %v1495_v5  ;;  %1478 = vmatpush3.bf16.msra.mxu1 %v1495_v5  ;;  %v95_v33 = vpack.c.bf16 %v63_v29, %v61_v28  ;;  %v1506_v37 = vld [vmem:[%s2312_s3 + $0x38] sm:$0xff]   ;;  %v37_v38 = vld [vmem:[%s2309_s0 + $0x48] sm:$0xff]  ;;  %v60_v40 = vld [vmem:[%s2309_s0 + $0x100] sm:$0xff]  ;;  %v80_v45 = vpack.c.bf16 %v34_v35, %v32_v34 }
   0xc   :  { %1291 = vmatprep.subr.bf16.mxu0 %v1496_v6  ;;  %1471 = vmatprep.subr.bf16.mxu1 %v1496_v6  ;;  %v39_v39 = vld [vmem:[%s2309_s0 + $0x58] sm:$0xff]  ;;  %v62_v41 = vld [vmem:[%s2309_s0 + $0x110] sm:$0xff]  ;;  %v65_v42 = vld [vmem:[%s2309_s0 + $0x128] sm:$0xff] }
   0xd   :  { %v1507_v43 = vld [vmem:[%s2312_s3 + $0x30] sm:$0xff]   ;;  %v67_v44 = vld [vmem:[%s2309_s0 + $0x138] sm:$0xff]  ;;  %v1508_v46 = vld [vmem:[%s2312_s3 + $0x28] sm:$0xff]   ;;  %v83_v47 = vpack.c.bf16 %v39_v39, %v37_v38  ;;  %v94_v48 = vpack.c.bf16 %v62_v41, %v60_v40 }
   0xe   :  { %v97_v49 = vpack.c.bf16 %v67_v44, %v65_v42  ;;  %v36_v50 = vld [vmem:[%s2309_s0 + $0x40] sm:$0xff]  ;;  %v38_v51 = vld [vmem:[%s2309_s0 + $0x50] sm:$0xff]  ;;  %v41_v52 = vld [vmem:[%s2309_s0 + $0x68] sm:$0xff] }
   0xf   :  { %1292 = vmatpush3.bf16.msra.mxu0 %v1497_v7  ;;  %1479 = vmatpush3.bf16.msra.mxu1 %v1497_v7  ;;  %v43_v53 = vld [vmem:[%s2309_s0 + $0x78] sm:$0xff]  ;;  %v64_v54 = vld [vmem:[%s2309_s0 + $0x120] sm:$0xff]  ;;  %v66_v55 = vld [vmem:[%s2309_s0 + $0x130] sm:$0xff] }
  0x10   :  { %1293 = vmatprep.subr.bf16.mxu0 %v1498_v8  ;;  %1472 = vmatprep.subr.bf16.mxu1 %v1498_v8  ;;  %v1509_v56 = vld [vmem:[%s2312_s3 + $0x20] sm:$0xff]   ;;  %v69_v57 = vld [vmem:[%s2309_s0 + $0x148] sm:$0xff]  ;;  %v71_v58 = vld [vmem:[%s2309_s0 + $0x158] sm:$0xff] }
  0x13   :  { %1294 = vmatpush3.bf16.msra.mxu0 %v1499_v9  ;;  %1480 = vmatpush3.bf16.msra.mxu1 %v1499_v9 }
  0x14   :  { %1295 = vmatprep.subr.bf16.mxu0 %v1500_v10  ;;  %1473 = vmatprep.subr.bf16.mxu1 %v1500_v10 }
  0x17   :  { %1296 = vmatpush3.bf16.msra.mxu0 %v1501_v14  ;;  %1481 = vmatpush3.bf16.msra.mxu1 %v1501_v14 }
  0x18   :  { %1297 = vmatprep.subr.bf16.mxu0 %v1502_v15  ;;  %1474 = vmatprep.subr.bf16.mxu1 %v1502_v15 }
  0x1b   :  { %1298 = vmatpush3.bf16.msra.mxu0 %v1503_v16  ;;  %1482 = vmatpush3.bf16.msra.mxu1 %v1503_v16 }
  0x1c   :  { %1299 = vmatprep.subr.bf16.mxu0 %v1504_v17  ;;  %1475 = vmatprep.subr.bf16.mxu1 %v1504_v17 }
  0x1f   :  { %1300 = vmatpush3.bf16.msra.mxu0 %v1505_v20  ;;  %1483 = vmatpush3.bf16.msra.mxu1 %v1505_v20 }
  0x20   :  { %1400 = vmatprep.subr.bf16.mxu1 %v1760_v36 }
  0x22   :  { %272 = vmatmul.mubr.bf16.vlgmr.msra.gmra.mxu0 %v78_v30  ;;  %328 = vmatmul.mubr.bf16.vlgmr.msra.gmra.mxu1 %v92_v32 }
  0x23   :  { %279 = vmatprep.mubr.bf16.mxu0 %v81_v31  ;;  %335 = vmatprep.mubr.bf16.mxu1 %v95_v33 }
  0x24   :  { %1401 = vmatpush3.bf16.msra.mxu1 %v1506_v37 }
  0x25   :  { %1402 = vmatprep.subr.bf16.mxu1 %v1760_v36 }
  0x28   :  { %1403 = vmatpush3.bf16.msra.mxu1 %v1507_v43 }
  0x29   :  { %1404 = vmatprep.subr.bf16.mxu1 %v1760_v36 }
  0x2a   :  { %280 = vmatmul.mubr.bf16.gmra.mxu0 %v80_v45  ;;  %336 = vmatmul.mubr.bf16.gmra.mxu1 %v94_v48 }
  0x2b   :  { %287 = vmatprep.mubr.bf16.mxu0 %v83_v47  ;;  %343 = vmatprep.mubr.bf16.mxu1 %v97_v49 }
  0x2c   :  { %1405 = vmatpush3.bf16.msra.mxu1 %v1508_v46 }
  0x2d   :  { %1406 = vmatprep.subr.bf16.mxu1 %v1760_v36 }
  0x2e   :  { %12 = vsyncpa [#allocation3], 0  ;;  %v82_v59 = vpack.c.bf16 %v38_v51, %v36_v50  ;;  %v85_v60 = vpack.c.bf16 %v43_v53, %v41_v52  ;;  %v96_v61 = vpack.c.bf16 %v66_v55, %v64_v54  ;;  %v99_v62 = vpack.c.bf16 %v71_v58, %v69_v57  ;;  %v1510_v63 = vld [vmem:[%s2312_s3 + $0x18] sm:$0xff]   ;;  %v40_v0 = vld [vmem:[%s2309_s0 + $0x60] sm:$0xff] }
  0x2f   :  { %v42_v1 = vld [vmem:[%s2309_s0 + $0x70] sm:$0xff]  ;;  %v45_v2 = vld [vmem:[%s2309_s0 + $0x88] sm:$0xff]  ;;  %v47_v3 = vld [vmem:[%s2309_s0 + $0x98] sm:$0xff]  ;;  %vm1761_vm0 = vmmov 0  }
  0x30   :  { %1407 = vmatpush3.bf16.msra.mxu1 %v1509_v56  ;;  %v68_v4 = vld [vmem:[%s2309_s0 + $0x140] sm:$0xff]  ;;  %v70_v5 = vld [vmem:[%s2309_s0 + $0x150] sm:$0xff]  ;;  %v73_v7 = vld [vmem:[%s2309_s0 + $0x168] sm:$0xff]  ;;  %v84_v9 = vpack.c.bf16 %v42_v1, %v40_v0  ;;  %v87_v10 = vpack.c.bf16 %v47_v3, %v45_v2 }
  0x31   :  { %1408 = vmatprep.subr.bf16.mxu1 %v1760_v36  ;;  %v1511_v6 = vld [vmem:[%s2312_s3 + $0x10] sm:$0xff]   ;;  %v75_v8 = vld [vmem:[%s2309_s0 + $0x178] sm:$0xff]  ;;  %v98_v11 = vpack.c.bf16 %v70_v5, %v68_v4  ;;  %v44_v13 = vld [vmem:[%s2309_s0 + $0x80] sm:$0xff] }
  0x32   :  { %288 = vmatmul.mubr.bf16.gmra.mxu0 %v82_v59  ;;  %344 = vmatmul.mubr.bf16.gmra.mxu1 %v96_v61  ;;  %v101_v12 = vpack.c.bf16 %v75_v8, %v73_v7  ;;  %v46_v14 = vld [vmem:[%s2309_s0 + $0x90] sm:$0xff]  ;;  %v49_v15 = vld [vmem:[%s2309_s0 + $0xa8] sm:$0xff]  ;;  %v51_v16 = vld [vmem:[%s2309_s0 + $0xb8] sm:$0xff] }
  0x33   :  { %295 = vmatprep.mubr.bf16.mxu0 %v85_v60  ;;  %351 = vmatprep.mubr.bf16.mxu1 %v99_v62  ;;  %v72_v17 = vld [vmem:[%s2309_s0 + $0x160] sm:$0xff]  ;;  %v74_v18 = vld [vmem:[%s2309_s0 + $0x170] sm:$0xff]  ;;  %v77_v19 = vld [vmem:[%s2309_s0 + $0x188] sm:$0xff]  ;;  %v86_v20 = vpack.c.bf16 %v46_v14, %v44_v13  ;;  %v89_v21 = vpack.c.bf16 %v51_v16, %v49_v15 }
  0x34   :  { %1409 = vmatpush3.bf16.msra.mxu1 %v1510_v63  ;;  %v100_v22 = vpack.c.bf16 %v74_v18, %v72_v17  ;;  %v103_v23 = vpack.c.bf16 %v77_v19, %v77_v19  ;;  %v48_v24 = vld [vmem:[%s2309_s0 + $0xa0] sm:$0xff]  ;;  %v50_v25 = vld [vmem:[%s2309_s0 + $0xb0] sm:$0xff]  ;;  %v53_v26 = vld [vmem:[%s2309_s0 + $0xc8] sm:$0xff] }
  0x35   :  { %1410 = vmatprep.subr.bf16.mxu1 %v1760_v36  ;;  %v55_v27 = vld [vmem:[%s2309_s0 + $0xd8] sm:$0xff]  ;;  %v76_v28 = vld [vmem:[%s2309_s0 + $0x180] sm:$0xff]  ;;  %v88_v29 = vpack.c.bf16 %v50_v25, %v48_v24  ;;  %v54_v33 = vld [vmem:[%s2309_s0 + $0xd0] sm:$0xff] }
  0x36   :  { %v91_v30 = vpack.c.bf16 %v55_v27, %v53_v26  ;;  %v102_v31 = vpack.c.bf16 %v76_v28, %v76_v28  ;;  %v52_v32 = vld [vmem:[%s2309_s0 + $0xc0] sm:$0xff]  ;;  %v1512_v35 = vld [vmem:[%s2312_s3 + $0x8] sm:$0xff]   ;;  %v1514_v38 = vld [vmem:[%s2314_s5 + $0x70] ss:$8 sps:$4 sm:$0xff]  }
  0x37   :  { %v90_v34 = vpack.c.bf16 %v54_v33, %v52_v32  ;;  %v1513_v37 = vld [vmem:[%s2312_s3] sm:$0xff]   ;;  %v1516_v39 = vld [vmem:[%s2314_s5 + $0x74] ss:$8 sps:$4 sm:$0xff]   ;;  %v1520_v43 = vld [vmem:[%s2314_s5 + $0x50] ss:$8 sps:$4 sm:$0xff]  }
  0x38   :  { %1411 = vmatpush3.bf16.msra.mxu1 %v1511_v6  ;;  %v1519_v40 = vld [vmem:[%s2314_s5 + $0x64] ss:$8 sps:$4 sm:$0xff]   ;;  %766 = vmatprep.subr.bf16.mxu0 %v1516_v39  ;;  %v1517_v41 = vld [vmem:[%s2314_s5 + $0x60] ss:$8 sps:$4 sm:$0xff]   ;;  %v1522_v42 = vld [vmem:[%s2314_s5 + $0x54] ss:$8 sps:$4 sm:$0xff]  }
  0x39   :  { %1412 = vmatprep.subr.bf16.mxu1 %v1760_v36  ;;  %767 = vmatpush1.bf16.msra.mxu0 %v1514_v38  ;;  %v1525_v44 = vld [vmem:[%s2314_s5 + $0x44] ss:$8 sps:$4 sm:$0xff]   ;;  %v1523_v45 = vld [vmem:[%s2314_s5 + $0x40] ss:$8 sps:$4 sm:$0xff]   ;;  %v1528_v46 = vld [vmem:[%s2314_s5 + $0x34] ss:$8 sps:$4 sm:$0xff]  }
  0x3a   :  { %296 = vmatmul.mubr.bf16.gmra.mxu0 %v84_v9  ;;  %352 = vmatmul.mubr.bf16.gmra.mxu1 %v98_v11  ;;  %v1526_v47 = vld [vmem:[%s2314_s5 + $0x30] ss:$8 sps:$4 sm:$0xff]   ;;  %v1531_v48 = vld [vmem:[%s2314_s5 + $0x24] ss:$8 sps:$4 sm:$0xff]   ;;  %v1529_v52 = vld [vmem:[%s2314_s5 + $0x20] ss:$8 sps:$4 sm:$0xff]  }
  0x3b   :  { %303 = vmatprep.mubr.bf16.mxu0 %v87_v10  ;;  %359 = vmatprep.mubr.bf16.mxu1 %v101_v12  ;;  %v1534_v55 = vld [vmem:[%s2314_s5 + $0x14] ss:$8 sps:$4 sm:$0xff]   ;;  %v2084_v56 = vld [vmem:[%s2311_s2] ss:$0 sm:$0xff]  ;;  %v1532_v60 = vld [vmem:[%s2314_s5 + $0x10] ss:$8 sps:$4 sm:$0xff]  }
  0x3c   :  { %1413 = vmatpush3.bf16.msra.mxu1 %v1512_v35  ;;  %768 = vmatprep.subr.bf16.mxu0 %v1519_v40 }
  0x3d   :  { %1414 = vmatprep.subr.bf16.mxu1 %v1760_v36  ;;  %769 = vmatpush1.bf16.msra.mxu0 %v1517_v41 }
  0x3e   :  { %770 = vmatprep.subr.bf16.mxu0 %v1522_v42 }
  0x40   :  { %1415 = vmatpush3.bf16.msra.mxu1 %v1513_v37 }
  0x41   :  { %771 = vmatpush1.bf16.msra.mxu0 %v1520_v43 }
  0x42   :  { %304 = vmatmul.mubr.bf16.gmra.mxu0 %v86_v20  ;;  %360 = vmatmul.mubr.bf16.gmra.mxu1 %v100_v22 }
  0x43   :  { %311 = vmatprep.mubr.bf16.mxu0 %v89_v21  ;;  %367 = vmatprep.mubr.bf16.mxu1 %v103_v23 }
  0x44   :  { %772 = vmatprep.subr.bf16.mxu0 %v1525_v44 }
  0x45   :  { %773 = vmatpush1.bf16.msra.mxu0 %v1523_v45 }
  0x46   :  { %774 = vmatprep.subr.bf16.mxu0 %v1528_v46 }
  0x49   :  { %775 = vmatpush1.bf16.msra.mxu0 %v1526_v47 }
  0x4a   :  { %312 = vmatmul.mubr.bf16.gmra.mxu0 %v88_v29  ;;  %368 = vmatmul.mubr.bf16.gmra.mxu1 %v102_v31 }
  0x4b   :  { %319 = vmatprep.mubr.bf16.mxu0 %v91_v30  ;;  %1416 = vmatprep.mubr.msk.bf16.mxu1 %vm1761_vm0, %v1760_v36 }
  0x4c   :  { %776 = vmatprep.subr.bf16.mxu0 %v1531_v48 }
  0x4d   :  { %777 = vmatpush1.bf16.msra.mxu0 %v1529_v52 }
  0x4e   :  { %778 = vmatprep.subr.bf16.mxu0 %v1534_v55 }
  0x51   :  { %779 = vmatpush1.bf16.msra.mxu0 %v1532_v60 }
  0x52   :  { %320 = vmatmul.mubr.bf16.gmra.mxu0 %v90_v34 }
  0xe2   :  { %v1301_v49 = vpop.f32.mrf.mxu0  ;;  %v2071_v50 = vpop.f32.mrf.mxu1 }
  0xe4   :  { %v1302_v51 = vpop.f32.mrf.mxu0  ;;  %v2076_v54 = vpop.f32.mrf.mxu1 }
  0xe5   :  { %v1303_v53 = vadd.f32 %v1302_v51, %v1301_v49 }
  0xe6   :  { %v1304_v57 = vpop.f32.mrf.mxu0  ;;  %v2086_v58 = vpop.f32.mrf.mxu1 }
  0xe7   :  { %v274_v61 = vadd.f32 %v1303_v53, %v2084_v56 }
  0xe8   :  { %v1305_v59 = vpop.f32.mrf.mxu0  ;;  %v2092_v63 = vpop.f32.mrf.mxu1 }
  0xe9   :  { %v1306_v62 = vadd.f32 %v1305_v59, %v1304_v57  ;;  %v375_v4 = vmax.f32 %v274_v61, 0.0 }
  0xea   :  { %v1307_v0 = vpop.f32.mrf.mxu0  ;;  %v2095_v2 = vpop.f32.mrf.mxu1 }
  0xeb   :  { %v277_v1 = vadd.f32 %v1306_v62, %v2084_v56 }
  0xec   :  { %v1308_v3 = vpop.f32.mrf.mxu0  ;;  %v2097_v7 = vpop.f32.mrf.mxu1 }
  0xed   :  { %v376_v5 = vmax.f32 %v277_v1, 0.0  ;;  %v1309_v6 = vadd.f32 %v1308_v3, %v1307_v0 }
  0xee   :  { %v1310_v8 = vpop.f32.mrf.mxu0  ;;  %v2099_v10 = vpop.f32.mrf.mxu1 }
  0xef   :  { %v400_v9 = vpack.c.bf16 %v376_v5, %v375_v4  ;;  %v282_v12 = vadd.f32 %v1309_v6, %v2084_v56 }
  0xf0   :  { %v1311_v11 = vpop.f32.mrf.mxu0  ;;  %v2102_v14 = vpop.f32.mrf.mxu1 }
  0xf1   :  { %v1312_v13 = vadd.f32 %v1311_v11, %v1310_v8  ;;  %1417 = vmatmul.mubr.bf16.vlgmr.msra.gmra.mxu1 %v400_v9  ;;  %v377_v19 = vmax.f32 %v282_v12, 0.0 }
  0xf2   :  { %v1313_v15 = vpop.f32.mrf.mxu0  ;;  %1420 = vmatprep.mubr.msk.bf16.mxu1 %vm1761_vm0, %v1760_v36  ;;  %v2107_v17 = vpop.f32.mrf.mxu1 }
  0xf3   :  { %v285_v16 = vadd.f32 %v1312_v13, %v2084_v56 }
  0xf4   :  { %v1314_v18 = vpop.f32.mrf.mxu0  ;;  %v2109_v22 = vpop.f32.mrf.mxu1 }
  0xf5   :  { %v378_v20 = vmax.f32 %v285_v16, 0.0  ;;  %v1315_v21 = vadd.f32 %v1314_v18, %v1313_v15 }
  0xf6   :  { %v1316_v23 = vpop.f32.mrf.mxu0  ;;  %v2111_v25 = vpop.f32.mrf.mxu1 }
  0xf7   :  { %v401_v24 = vpack.c.bf16 %v378_v20, %v377_v19  ;;  %v290_v27 = vadd.f32 %v1315_v21, %v2084_v56 }
  0xf8   :  { %v1317_v26 = vpop.f32.mrf.mxu0  ;;  %v2114_v29 = vpop.f32.mrf.mxu1 }
  0xf9   :  { %v1318_v28 = vadd.f32 %v1317_v26, %v1316_v23  ;;  %1421 = vmatmul.mubr.bf16.gmra.mxu1 %v401_v24  ;;  %v379_v34 = vmax.f32 %v290_v27, 0.0 }
  0xfa   :  { %v1319_v30 = vpop.f32.mrf.mxu0  ;;  %1424 = vmatprep.mubr.msk.bf16.mxu1 %vm1761_vm0, %v1760_v36  ;;  %v2119_v32 = vpop.f32.mrf.mxu1 }
  0xfb   :  { %v293_v31 = vadd.f32 %v1318_v28, %v2084_v56 }
  0xfc   :  { %v1320_v33 = vpop.f32.mrf.mxu0  ;;  %v2121_v38 = vpop.f32.mrf.mxu1 }
  0xfd   :  { %v380_v35 = vmax.f32 %v293_v31, 0.0  ;;  %v1321_v37 = vadd.f32 %v1320_v33, %v1319_v30 }
  0xfe   :  { %v1322_v39 = vpop.f32.mrf.mxu0  ;;  %v2123_v41 = vpop.f32.mrf.mxu1 }
  0xff   :  { %v402_v40 = vpack.c.bf16 %v380_v35, %v379_v34  ;;  %v298_v43 = vadd.f32 %v1321_v37, %v2084_v56 }
 0x100   :  { %v1323_v42 = vpop.f32.mrf.mxu0  ;;  %v2126_v45 = vpop.f32.mrf.mxu1 }
 0x101   :  { %v1324_v44 = vadd.f32 %v1323_v42, %v1322_v39  ;;  %1425 = vmatmul.mubr.bf16.gmra.mxu1 %v402_v40  ;;  %v381_v51 = vmax.f32 %v298_v43, 0.0  ;;  %v1345_v39 = vadd.f32 %v2076_v54, %v2071_v50  ;;  %v1348_v42 = vadd.f32 %v2092_v63, %v2086_v58 }
 0x102   :  { %v1325_v46 = vpop.f32.mrf.mxu0  ;;  %1428 = vmatprep.mubr.msk.bf16.mxu1 %vm1761_vm0, %v1760_v36  ;;  %v2131_v48 = vpop.f32.mrf.mxu1  ;;  %v1351_v50 = vadd.f32 %v2097_v7, %v2095_v2  ;;  %v1354_v54 = vadd.f32 %v2102_v14, %v2099_v10  ;;  %v1360_v2 = vadd.f32 %v2114_v29, %v2111_v25  ;;  %v1537_v25 = vld [vmem:[%s2314_s5 + $0x4] ss:$8 sps:$4 sm:$0xff]  }
 0x103   :  { %v301_v47 = vadd.f32 %v1324_v44, %v2084_v56  ;;  %780 = vmatprep.subr.bf16.mxu0 %v1537_v25 }
 0x104   :  { %v1326_v49 = vpop.f32.mrf.mxu0  ;;  %v2133_v55 = vpop.f32.mrf.mxu1  ;;  %v338_v58 = vadd.f32 %v1351_v50, %v2084_v56  ;;  %v341_v63 = vadd.f32 %v1354_v54, %v2084_v56  ;;  %v349_v10 = vadd.f32 %v1360_v2, %v2084_v56 }
 0x105   :  { %v382_v52 = vmax.f32 %v301_v47, 0.0  ;;  %v1327_v53 = vadd.f32 %v1326_v49, %v1325_v46  ;;  %v330_v46 = vadd.f32 %v1345_v39, %v2084_v56  ;;  %v333_v47 = vadd.f32 %v1348_v42, %v2084_v56 }
 0x106   :  { %v1328_v57 = vpop.f32.mrf.mxu0  ;;  %v2135_v60 = vpop.f32.mrf.mxu1 }
 0x107   :  { %v403_v59 = vpack.c.bf16 %v382_v52, %v381_v51  ;;  %v306_v62 = vadd.f32 %v1327_v53, %v2084_v56  ;;  %v389_v51 = vmax.f32 %v330_v46, 0.0  ;;  %v390_v52 = vmax.f32 %v333_v47, 0.0 }
 0x108   :  { %v1329_v61 = vpop.f32.mrf.mxu0  ;;  %v2138_v1 = vpop.f32.mrf.mxu1 }
 0x109   :  { %v1330_v0 = vadd.f32 %v1329_v61, %v1328_v57  ;;  %1429 = vmatmul.mubr.bf16.gmra.mxu1 %v403_v59  ;;  %v383_v8 = vmax.f32 %v306_v62, 0.0  ;;  %v407_v53 = vpack.c.bf16 %v390_v52, %v389_v51  ;;  %v391_v57 = vmax.f32 %v338_v58, 0.0 }
 0x10a   :  { %v1331_v3 = vpop.f32.mrf.mxu0  ;;  %1432 = vmatprep.mubr.msk.bf16.mxu1 %vm1761_vm0, %v1760_v36  ;;  %v2143_v5 = vpop.f32.mrf.mxu1  ;;  %v392_v59 = vmax.f32 %v341_v63, 0.0  ;;  %v1357_v61 = vadd.f32 %v2109_v22, %v2107_v17  ;;  %v1366_v17 = vadd.f32 %v2126_v45, %v2123_v41  ;;  %v1535_v22 = vld [vmem:[%s2314_s5] ss:$8 sps:$4 sm:$0xff]   ;;  %v1369_v41 = vadd.f32 %v2133_v55, %v2131_v48 }
 0x10b   :  { %v309_v4 = vadd.f32 %v1330_v0, %v2084_v56  ;;  %v394_v0 = vmax.f32 %v349_v10, 0.0  ;;  %781 = vmatpush1.bf16.msra.mxu0 %v1535_v22  ;;  %v1372_v45 = vadd.f32 %v2138_v1, %v2135_v60 }
 0x10c   :  { %v1332_v6 = vpop.f32.mrf.mxu0  ;;  %v2145_v12 = vpop.f32.mrf.mxu1  ;;  %v346_v7 = vadd.f32 %v1357_v61, %v2084_v56  ;;  %v408_v14 = vpack.c.bf16 %v392_v59, %v391_v57 }
 0x10d   :  { %v384_v9 = vmax.f32 %v309_v4, 0.0  ;;  %v1333_v11 = vadd.f32 %v1332_v6, %v1331_v3  ;;  %v1363_v3 = vadd.f32 %v2121_v38, %v2119_v32  ;;  %v357_v4 = vadd.f32 %v1366_v17, %v2084_v56 }
 0x10e   :  { %v1334_v13 = vpop.f32.mrf.mxu0  ;;  %v1376_v16 = vpop.f32.mrf.mxu1  ;;  %v393_v62 = vmax.f32 %v346_v7, 0.0 }
 0x10f   :  { %v404_v15 = vpack.c.bf16 %v384_v9, %v383_v8  ;;  %v314_v19 = vadd.f32 %v1333_v11, %v2084_v56  ;;  %v354_v29 = vadd.f32 %v1363_v3, %v2084_v56  ;;  %v396_v38 = vmax.f32 %v357_v4, 0.0 }
 0x110   :  { %v1335_v18 = vpop.f32.mrf.mxu0  ;;  %v1377_v21 = vpop.f32.mrf.mxu1  ;;  %v409_v6 = vpack.c.bf16 %v394_v0, %v393_v62  ;;  %v1762_v8 = vmov 0   ;;  %v362_v9 = vadd.f32 %v1369_v41, %v2084_v56  ;;  %v365_v11 = vadd.f32 %v1372_v45, %v2084_v56 }
 0x111   :  { %v1336_v20 = vadd.f32 %v1335_v18, %v1334_v13  ;;  %1433 = vmatmul.mubr.bf16.gmra.mxu1 %v404_v15  ;;  %v385_v27 = vmax.f32 %v314_v19, 0.0  ;;  %v395_v32 = vmax.f32 %v354_v29, 0.0  ;;  %798 = vmatprep.mubr.bf16.mxu0 %v1762_v8  ;;  %v1375_v15 = vadd.f32 %v2145_v12, %v2143_v5  ;;  %v2210_v19 = vld [vmem:[%s2313_s4] ss:$0 sm:$0xff] }
 0x112   :  { %v1337_v23 = vpop.f32.mrf.mxu0  ;;  %1436 = vmatprep.mubr.msk.bf16.mxu1 %vm1761_vm0, %v1760_v36  ;;  %v397_v16 = vmax.f32 %v362_v9, 0.0  ;;  %v398_v48 = vmax.f32 %v365_v11, 0.0 }
 0x113   :  { %v317_v24 = vadd.f32 %v1336_v20, %v2084_v56  ;;  %v410_v13 = vpack.c.bf16 %v396_v38, %v395_v32  ;;  %v370_v55 = vadd.f32 %v1375_v15, %v2084_v56 }
 0x114   :  { %v1338_v26 = vpop.f32.mrf.mxu0  ;;  %v411_v60 = vpack.c.bf16 %v398_v48, %v397_v16 }
 0x115   :  { %v386_v28 = vmax.f32 %v317_v24, 0.0  ;;  %v1339_v30 = vadd.f32 %v1338_v26, %v1337_v23  ;;  %v399_v1 = vmax.f32 %v370_v55, 0.0 }
 0x116   :  { %v1340_v31 = vpop.f32.mrf.mxu0 }
 0x117   :  { %v405_v33 = vpack.c.bf16 %v386_v28, %v385_v27  ;;  %v322_v35 = vadd.f32 %v1339_v30, %v2084_v56  ;;  %v412_v18 = vpack.c.bf16 %v399_v1, %v399_v1 }
 0x118   :  { %v1341_v34 = vpop.f32.mrf.mxu0 }
 0x119   :  { %v1342_v37 = vadd.f32 %v1341_v34, %v1340_v31  ;;  %1437 = vmatmul.mubr.bf16.gmra.mxu1 %v405_v33  ;;  %v387_v43 = vmax.f32 %v322_v35, 0.0 }
 0x11a   :  { %1440 = vmatprep.mubr.msk.bf16.mxu1 %vm1761_vm0, %v1760_v36 }
 0x11b   :  { %v325_v40 = vadd.f32 %v1342_v37, %v2084_v56 }
 0x11d   :  { %v388_v44 = vmax.f32 %v325_v40, 0.0 }
 0x11f   :  { %v406_v49 = vpack.c.bf16 %v388_v44, %v387_v43 }
 0x121   :  { %1441 = vmatmul.mubr.bf16.gmra.mxu1 %v406_v49 }
 0x122   :  { %1444 = vmatprep.mubr.msk.bf16.mxu1 %vm1761_vm0, %v1760_v36 }
 0x129   :  { %1445 = vmatmul.mubr.bf16.gmra.mxu1 %v407_v53 }
 0x12a   :  { %1448 = vmatprep.mubr.msk.bf16.mxu1 %vm1761_vm0, %v1760_v36 }
 0x131   :  { %1449 = vmatmul.mubr.bf16.gmra.mxu1 %v408_v14 }
 0x132   :  { %1452 = vmatprep.mubr.msk.bf16.mxu1 %vm1761_vm0, %v1760_v36 }
 0x139   :  { %1453 = vmatmul.mubr.bf16.gmra.mxu1 %v409_v6 }
 0x13a   :  { %1456 = vmatprep.mubr.msk.bf16.mxu1 %vm1761_vm0, %v1760_v36 }
 0x141   :  { %1457 = vmatmul.mubr.bf16.gmra.mxu1 %v410_v13 }
 0x142   :  { %1460 = vmatprep.mubr.msk.bf16.mxu1 %vm1761_vm0, %v1760_v36 }
 0x149   :  { %1461 = vmatmul.mubr.bf16.gmra.mxu1 %v411_v60 }
 0x14a   :  { %1464 = vmatprep.mubr.msk.bf16.mxu1 %vm1761_vm0, %v1760_v36 }
 0x151   :  { %1465 = vmatmul.mubr.bf16.gmra.mxu1 %v412_v18 }
 0x1b1   :  { %v518_v5 = vpop.f32.mrf.mxu1 }
 0x1b2   :  { %v519_v20 = vadd.f32 %v2210_v19, %v518_v5 }
 0x1b3   :  { %v1418_v12 = vpop.f32.mrf.mxu1 }
 0x1b4   :  { %v620_v24 = vmax.f32 %v519_v20, 0.0 }
 0x1b5   :  { %v521_v21 = vpop.f32.mrf.mxu1 }
 0x1b6   :  { %v522_v56 = vadd.f32 %v2210_v19, %v521_v21 }
 0x1b7   :  { %v1419_v23 = vpop.f32.mrf.mxu1 }
 0x1b8   :  { %v621_v26 = vmax.f32 %v522_v56, 0.0 }
 0x1b9   :  { %v526_v27 = vpop.f32.mrf.mxu1 }
 0x1ba   :  { %v645_v28 = vpack.c.bf16 %v621_v26, %v620_v24  ;;  %v527_v30 = vadd.f32 %v2210_v19, %v526_v27 }
 0x1bb   :  { %v1422_v36 = vpop.f32.mrf.mxu1 }
 0x1bc   :  { %799 = vmatmul.mubr.bf16.vlgmr.msra.gmra.mxu0 %v645_v28  ;;  %v622_v35 = vmax.f32 %v527_v30, 0.0 }
 0x1bd   :  { %v529_v31 = vpop.f32.mrf.mxu1  ;;  %808 = vmatprep.mubr.bf16.mxu0 %v1762_v8 }
 0x1be   :  { %v530_v33 = vadd.f32 %v2210_v19, %v529_v31 }
 0x1bf   :  { %v1423_v34 = vpop.f32.mrf.mxu1 }
 0x1c0   :  { %v623_v37 = vmax.f32 %v530_v33, 0.0 }
 0x1c1   :  { %v534_v39 = vpop.f32.mrf.mxu1 }
 0x1c2   :  { %v646_v40 = vpack.c.bf16 %v623_v37, %v622_v35  ;;  %v535_v43 = vadd.f32 %v2210_v19, %v534_v39 }
 0x1c3   :  { %v1426_v42 = vpop.f32.mrf.mxu1 }
 0x1c4   :  { %809 = vmatmul.mubr.bf16.gmra.mxu0 %v646_v40  ;;  %v624_v49 = vmax.f32 %v535_v43, 0.0 }
 0x1c5   :  { %v537_v44 = vpop.f32.mrf.mxu1  ;;  %818 = vmatprep.mubr.bf16.mxu0 %v1762_v8 }
 0x1c6   :  { %v538_v46 = vadd.f32 %v2210_v19, %v537_v44 }
 0x1c7   :  { %v1427_v47 = vpop.f32.mrf.mxu1 }
 0x1c8   :  { %v625_v51 = vmax.f32 %v538_v46, 0.0 }
 0x1c9   :  { %v542_v52 = vpop.f32.mrf.mxu1 }
 0x1ca   :  { %v647_v50 = vpack.c.bf16 %v625_v51, %v624_v49  ;;  %v543_v58 = vadd.f32 %v2210_v19, %v542_v52 }
 0x1cb   :  { %v1430_v54 = vpop.f32.mrf.mxu1 }
 0x1cc   :  { %819 = vmatmul.mubr.bf16.gmra.mxu0 %v647_v50  ;;  %v626_v59 = vmax.f32 %v543_v58, 0.0 }
 0x1cd   :  { %v545_v63 = vpop.f32.mrf.mxu1  ;;  %828 = vmatprep.mubr.bf16.mxu0 %v1762_v8 }
 0x1ce   :  { %v546_v53 = vadd.f32 %v2210_v19, %v545_v63 }
 0x1cf   :  { %v1431_v57 = vpop.f32.mrf.mxu1 }
 0x1d0   :  { %v627_v61 = vmax.f32 %v546_v53, 0.0 }
 0x1d1   :  { %v550_v2 = vpop.f32.mrf.mxu1 }
 0x1d2   :  { %v648_v7 = vpack.c.bf16 %v627_v61, %v626_v59  ;;  %v551_v14 = vadd.f32 %v2210_v19, %v550_v2 }
 0x1d3   :  { %v1434_v10 = vpop.f32.mrf.mxu1 }
 0x1d4   :  { %829 = vmatmul.mubr.bf16.gmra.mxu0 %v648_v7  ;;  %v628_v17 = vmax.f32 %v551_v14, 0.0 }
 0x1d5   :  { %v553_v62 = vpop.f32.mrf.mxu1  ;;  %838 = vmatprep.mubr.bf16.mxu0 %v1762_v8 }
 0x1d6   :  { %v554_v0 = vadd.f32 %v2210_v19, %v553_v62 }
 0x1d7   :  { %v1435_v3 = vpop.f32.mrf.mxu1 }
 0x1d8   :  { %v629_v22 = vmax.f32 %v554_v0, 0.0 }
 0x1d9   :  { %v558_v25 = vpop.f32.mrf.mxu1 }
 0x1da   :  { %v649_v29 = vpack.c.bf16 %v629_v22, %v628_v17  ;;  %v559_v6 = vadd.f32 %v2210_v19, %v558_v25 }
 0x1db   :  { %v1438_v4 = vpop.f32.mrf.mxu1 }
 0x1dc   :  { %839 = vmatmul.mubr.bf16.gmra.mxu0 %v649_v29  ;;  %v630_v45 = vmax.f32 %v559_v6, 0.0 }
 0x1dd   :  { %v561_v32 = vpop.f32.mrf.mxu1  ;;  %848 = vmatprep.mubr.bf16.mxu0 %v1762_v8 }
 0x1de   :  { %v562_v38 = vadd.f32 %v2210_v19, %v561_v32 }
 0x1df   :  { %v1439_v41 = vpop.f32.mrf.mxu1 }
 0x1e0   :  { %v631_v9 = vmax.f32 %v562_v38, 0.0 }
 0x1e1   :  { %v566_v11 = vpop.f32.mrf.mxu1 }
 0x1e2   :  { %v650_v13 = vpack.c.bf16 %v631_v9, %v630_v45  ;;  %v567_v16 = vadd.f32 %v2210_v19, %v566_v11  ;;  %v676_v11 = vlaneseq }
 0x1e3   :  { %v1442_v15 = vpop.f32.mrf.mxu1 }
 0x1e4   :  { %849 = vmatmul.mubr.bf16.gmra.mxu0 %v650_v13  ;;  %v632_v1 = vmax.f32 %v567_v16, 0.0  ;;  %v677_v13 = vshrl.u32 %v676_v11, 7  ;;  %v674_v16 = vld [vmem:[%s2315_s6] sm:$0x3]  ;;  %s1763_s6 = smov [#allocation2]  }
 0x1e5   :  { %v569_v48 = vpop.f32.mrf.mxu1  ;;  %858 = vmatprep.mubr.bf16.mxu0 %v1762_v8  ;;  %s1232_s13 = sshll.u32 %s1763_s6, 4  ;;  %s1233_s13 = int_to_ptr.vmem [resolvable:$true] %s1232_s13 }
 0x1e6   :  { %v570_v55 = vadd.f32 %v2210_v19, %v569_v48  ;;  %v678_v15 = vsub.s32 0, %v677_v13  ;;  %v682_v48 = vsub.s32 1, %v677_v13  ;;  %s1738_s14 = scalar_lea.vmem %s1233_s13, 6400  ;;  %p1743_p1 = scmp.lt.s32.totalorder %s1233_s13, %s1233_s13 }
 0x1e7   :  { %v1443_v60 = vpop.f32.mrf.mxu1  ;;  %p1739_p0 = scmp.ne.s32.totalorder %s1233_s13, %s1738_s14  ;;  %p1744_p2 = scmp.lt.s32.totalorder %s1738_s14, %s1738_s14 }
 0x1e8   :  { %v633_v18 = vmax.f32 %v570_v55, 0.0  ;;  %v2252_v55 = vrot.slane %v674_v16, %v678_v15 }
 0x1e9   :  { %v574_v5 = vpop.f32.mrf.mxu1  ;;  %p1745_p3 = por %p1744_p2, %p1743_p1 }
 0x1ea   :  { %v651_v12 = vpack.c.bf16 %v633_v18, %v632_v1  ;;  %v575_v21 = vadd.f32 %v2210_v19, %v574_v5 }
 0x1eb   :  { %v1446_v20 = vpop.f32.mrf.mxu1  ;;  %p1746_p4 = pnand %p1745_p3, %p1739_p0 }
 0x1ec   :  { %859 = vmatmul.mubr.bf16.gmra.mxu0 %v651_v12  ;;  %v634_v26 = vmax.f32 %v575_v21, 0.0 }
 0x1ed   :  { %v577_v56 = vpop.f32.mrf.mxu1  ;;  %868 = vmatprep.mubr.bf16.mxu0 %v1762_v8 }
 0x1ee   :  { %v578_v23 = vadd.f32 %v2210_v19, %v577_v56 }
 0x1ef   :  { %v1447_v24 = vpop.f32.mrf.mxu1 }
 0x1f0   :  { %v635_v27 = vmax.f32 %v578_v23, 0.0 }
 0x1f1   :  { %v582_v28 = vpop.f32.mrf.mxu1 }
 0x1f2   :  { %v652_v36 = vpack.c.bf16 %v635_v27, %v634_v26  ;;  %v583_v31 = vadd.f32 %v2210_v19, %v582_v28 }
 0x1f3   :  { %v1450_v30 = vpop.f32.mrf.mxu1 }
 0x1f4   :  { %869 = vmatmul.mubr.bf16.gmra.mxu0 %v652_v36  ;;  %v636_v37 = vmax.f32 %v583_v31, 0.0 }
 0x1f5   :  { %v585_v33 = vpop.f32.mrf.mxu1  ;;  %878 = vmatprep.mubr.bf16.mxu0 %v1762_v8 }
 0x1f6   :  { %v586_v34 = vadd.f32 %v2210_v19, %v585_v33 }
 0x1f7   :  { %v1451_v35 = vpop.f32.mrf.mxu1 }
 0x1f8   :  { %v637_v39 = vmax.f32 %v586_v34, 0.0 }
 0x1f9   :  { %v590_v40 = vpop.f32.mrf.mxu1 }
 0x1fa   :  { %v653_v42 = vpack.c.bf16 %v637_v39, %v636_v37  ;;  %v591_v44 = vadd.f32 %v2210_v19, %v590_v40 }
 0x1fb   :  { %v1454_v43 = vpop.f32.mrf.mxu1 }
 0x1fc   :  { %879 = vmatmul.mubr.bf16.gmra.mxu0 %v653_v42  ;;  %v638_v51 = vmax.f32 %v591_v44, 0.0 }
 0x1fd   :  { %v593_v46 = vpop.f32.mrf.mxu1  ;;  %888 = vmatprep.mubr.bf16.mxu0 %v1762_v8 }
 0x1fe   :  { %v594_v47 = vadd.f32 %v2210_v19, %v593_v46 }
 0x1ff   :  { %v1455_v49 = vpop.f32.mrf.mxu1 }
 0x200   :  { %v639_v52 = vmax.f32 %v594_v47, 0.0 }
 0x201   :  { %v598_v50 = vpop.f32.mrf.mxu1 }
 0x202   :  { %v654_v54 = vpack.c.bf16 %v639_v52, %v638_v51  ;;  %v599_v63 = vadd.f32 %v2210_v19, %v598_v50 }
 0x203   :  { %v1458_v58 = vpop.f32.mrf.mxu1 }
 0x204   :  { %889 = vmatmul.mubr.bf16.gmra.mxu0 %v654_v54  ;;  %v640_v61 = vmax.f32 %v599_v63, 0.0 }
 0x205   :  { %v601_v53 = vpop.f32.mrf.mxu1  ;;  %898 = vmatprep.mubr.bf16.mxu0 %v1762_v8 }
 0x206   :  { %v602_v57 = vadd.f32 %v2210_v19, %v601_v53 }
 0x207   :  { %v1459_v59 = vpop.f32.mrf.mxu1 }
 0x208   :  { %v641_v2 = vmax.f32 %v602_v57, 0.0 }
 0x209   :  { %v606_v7 = vpop.f32.mrf.mxu1 }
 0x20a   :  { %v655_v10 = vpack.c.bf16 %v641_v2, %v640_v61  ;;  %v607_v62 = vadd.f32 %v2210_v19, %v606_v7 }
 0x20b   :  { %v1462_v14 = vpop.f32.mrf.mxu1 }
 0x20c   :  { %899 = vmatmul.mubr.bf16.gmra.mxu0 %v655_v10  ;;  %v642_v22 = vmax.f32 %v607_v62, 0.0 }
 0x20d   :  { %v609_v0 = vpop.f32.mrf.mxu1  ;;  %908 = vmatprep.mubr.bf16.mxu0 %v1762_v8 }
 0x20e   :  { %v610_v3 = vadd.f32 %v2210_v19, %v609_v0 }
 0x20f   :  { %v1463_v17 = vpop.f32.mrf.mxu1 }
 0x210   :  { %v643_v25 = vmax.f32 %v610_v3, 0.0 }
 0x211   :  { %v614_v29 = vpop.f32.mrf.mxu1 }
 0x212   :  { %v656_v4 = vpack.c.bf16 %v643_v25, %v642_v22  ;;  %v615_v6 = vadd.f32 %v2210_v19, %v614_v29  ;;  %v2254_v19 = vrot.slane %v674_v16, %v682_v48 }
 0x213   :  { %v1466_v32 = vpop.f32.mrf.mxu1 }
 0x214   :  { %909 = vmatmul.mubr.bf16.gmra.mxu0 %v656_v4  ;;  %v644_v41 = vmax.f32 %v615_v6, 0.0 }
 0x215   :  { %v617_v38 = vpop.f32.mrf.mxu1  ;;  %918 = vmatprep.mubr.bf16.mxu0 %v1762_v8 }
 0x216   :  { %v657_v9 = vpack.c.bf16 %v644_v41, %v644_v41 }
 0x217   :  { %v1467_v45 = vpop.f32.mrf.mxu1 }
 0x21c   :  { %919 = vmatmul.mubr.bf16.gmra.mxu0 %v657_v9 }
 0x27c   :  { %v800_v60 = vpop.f32.mrf.mxu0 }
 0x27d   :  { %v801_v1 = vadd.f32 %v800_v60, %v2252_v55 }
 0x27e   :  { %v802_v8 = vpop.f32.mrf.mxu0 }
 0x27f   :  { %v927_v18 = vsub.f32 0.0, %v801_v1  ;;  %v803_v5 = vadd.f32 %v802_v8, %v2254_v19 }
 0x280   :  { %v804_v12 = vpop.f32.mrf.mxu0 }
 0x281   :  { %v977_v20 = vmul.f32 1.442695, %v927_v18  ;;  %v928_v21 = vsub.f32 0.0, %v803_v5  ;;  %v805_v56 = vadd.f32 %v804_v12, %v2252_v55 }
 0x282   :  { %v806_v23 = vpop.f32.mrf.mxu0 }
 0x283   :  { %1538 = vpow2.f32 %v977_v20  ;;  %v979_v24 = vmul.f32 1.442695, %v928_v21  ;;  %v929_v26 = vsub.f32 0.0, %v805_v56  ;;  %v807_v27 = vadd.f32 %v806_v23, %v2254_v19 }
 0x284   :  { %v810_v28 = vpop.f32.mrf.mxu0 }
 0x285   :  { %1540 = vpow2.f32 %v979_v24  ;;  %v981_v36 = vmul.f32 1.442695, %v929_v26  ;;  %v930_v30 = vsub.f32 0.0, %v807_v27  ;;  %v811_v31 = vadd.f32 %v810_v28, %v2252_v55 }
 0x286   :  { %v812_v33 = vpop.f32.mrf.mxu0 }
 0x287   :  { %1542 = vpow2.f32 %v981_v36  ;;  %v983_v34 = vmul.f32 1.442695, %v930_v30  ;;  %v931_v35 = vsub.f32 0.0, %v811_v31  ;;  %v813_v37 = vadd.f32 %v812_v33, %v2254_v19 }
 0x288   :  { %v814_v39 = vpop.f32.mrf.mxu0 }
 0x289   :  { %1544 = vpow2.f32 %v983_v34  ;;  %v985_v40 = vmul.f32 1.442695, %v931_v35  ;;  %v932_v42 = vsub.f32 0.0, %v813_v37  ;;  %v815_v43 = vadd.f32 %v814_v39, %v2252_v55 }
 0x28a   :  { %v816_v44 = vpop.f32.mrf.mxu0 }
 0x28b   :  { %1546 = vpow2.f32 %v985_v40  ;;  %v987_v46 = vmul.f32 1.442695, %v932_v42  ;;  %v933_v47 = vsub.f32 0.0, %v815_v43  ;;  %v817_v49 = vadd.f32 %v816_v44, %v2254_v19 }
 0x28c   :  { %v820_v51 = vpop.f32.mrf.mxu0 }
 0x28d   :  { %1548 = vpow2.f32 %v987_v46  ;;  %v989_v52 = vmul.f32 1.442695, %v933_v47  ;;  %v934_v50 = vsub.f32 0.0, %v817_v49  ;;  %v821_v54 = vadd.f32 %v820_v51, %v2252_v55 }
 0x28e   :  { %v822_v58 = vpop.f32.mrf.mxu0 }
 0x28f   :  { %1550 = vpow2.f32 %v989_v52  ;;  %v991_v63 = vmul.f32 1.442695, %v934_v50  ;;  %v935_v53 = vsub.f32 0.0, %v821_v54  ;;  %v823_v57 = vadd.f32 %v822_v58, %v2254_v19 }
 0x290   :  { %v1539_v59 = vpop.eup %1538  ;;  %v824_v61 = vpop.f32.mrf.mxu0 }
 0x291   :  { %v1077_v2 = vadd.f32 1.0, %v1539_v59  ;;  %1552 = vpow2.f32 %v991_v63  ;;  %v993_v7 = vmul.f32 1.442695, %v935_v53  ;;  %v936_v10 = vsub.f32 0.0, %v823_v57 }
 0x292   :  { %v1541_v14 = vpop.eup %1540  ;;  %v825_v62 = vadd.f32 %v824_v61, %v2252_v55  ;;  %v826_v0 = vpop.f32.mrf.mxu0 }
 0x293   :  { %1554 = vrcp.f32 %v1077_v2  ;;  %v1078_v3 = vadd.f32 1.0, %v1541_v14  ;;  %v995_v17 = vmul.f32 1.442695, %v936_v10  ;;  %v827_v22 = vadd.f32 %v826_v0, %v2254_v19 }
 0x294   :  { %v1543_v25 = vpop.eup %1542  ;;  %1556 = vpow2.f32 %v993_v7  ;;  %v937_v29 = vsub.f32 0.0, %v825_v62  ;;  %v830_v4 = vpop.f32.mrf.mxu0 }
 0x295   :  { %1558 = vrcp.f32 %v1078_v3  ;;  %v1079_v6 = vadd.f32 1.0, %v1543_v25  ;;  %v938_v32 = vsub.f32 0.0, %v827_v22  ;;  %v831_v38 = vadd.f32 %v830_v4, %v2252_v55 }
 0x296   :  { %v1545_v41 = vpop.eup %1544  ;;  %1560 = vpow2.f32 %v995_v17  ;;  %v997_v45 = vmul.f32 1.442695, %v937_v29  ;;  %v832_v9 = vpop.f32.mrf.mxu0 }
 0x297   :  { %1562 = vrcp.f32 %v1079_v6  ;;  %v1080_v11 = vadd.f32 1.0, %v1545_v41  ;;  %v999_v13 = vmul.f32 1.442695, %v938_v32  ;;  %v939_v15 = vsub.f32 0.0, %v831_v38 }
 0x298   :  { %v1547_v16 = vpop.eup %1546  ;;  %1564 = vpow2.f32 %v997_v45  ;;  %v833_v48 = vadd.f32 %v832_v9, %v2254_v19  ;;  %v834_v60 = vpop.f32.mrf.mxu0 }
 0x299   :  { %1566 = vrcp.f32 %v1080_v11  ;;  %v1081_v1 = vadd.f32 1.0, %v1547_v16  ;;  %v1001_v8 = vmul.f32 1.442695, %v939_v15  ;;  %v835_v18 = vadd.f32 %v834_v60, %v2252_v55 }
 0x29a   :  { %v1549_v5 = vpop.eup %1548  ;;  %1568 = vpow2.f32 %v999_v13  ;;  %v940_v12 = vsub.f32 0.0, %v833_v48  ;;  %v836_v20 = vpop.f32.mrf.mxu0 }
 0x29b   :  { %1570 = vrcp.f32 %v1081_v1  ;;  %v1082_v21 = vadd.f32 1.0, %v1549_v5  ;;  %v941_v56 = vsub.f32 0.0, %v835_v18  ;;  %v837_v23 = vadd.f32 %v836_v20, %v2254_v19 }
 0x29c   :  { %v1551_v24 = vpop.eup %1550  ;;  %1572 = vpow2.f32 %v1001_v8  ;;  %v1003_v26 = vmul.f32 1.442695, %v940_v12  ;;  %v840_v27 = vpop.f32.mrf.mxu0 }
 0x29d   :  { %1574 = vrcp.f32 %v1082_v21  ;;  %v1083_v28 = vadd.f32 1.0, %v1551_v24  ;;  %v1005_v36 = vmul.f32 1.442695, %v941_v56  ;;  %v942_v30 = vsub.f32 0.0, %v837_v23 }
 0x29e   :  { %v1553_v31 = vpop.eup %1552  ;;  %1576 = vpow2.f32 %v1003_v26  ;;  %v841_v33 = vadd.f32 %v840_v27, %v2252_v55  ;;  %v842_v34 = vpop.f32.mrf.mxu0 }
 0x29f   :  { %1578 = vrcp.f32 %v1083_v28  ;;  %v1084_v35 = vadd.f32 1.0, %v1553_v31  ;;  %v1007_v37 = vmul.f32 1.442695, %v942_v30  ;;  %v843_v39 = vadd.f32 %v842_v34, %v2254_v19 }
 0x2a0   :  { %v1555_v40 = vpop.eup %1554  ;;  %1580 = vpow2.f32 %v1005_v36  ;;  %v943_v42 = vsub.f32 0.0, %v841_v33  ;;  %v844_v43 = vpop.f32.mrf.mxu0 }
 0x2a1   :  { %v1557_v44 = vpop.eup %1556  ;;  %1177 = vst [vmem:[#allocation2] sm:$0xff] %v1555_v40  ;;  %1582 = vrcp.f32 %v1084_v35  ;;  %v944_v46 = vsub.f32 0.0, %v843_v39  ;;  %v845_v47 = vadd.f32 %v844_v43, %v2252_v55 }
 0x2a2   :  { %v1559_v49 = vpop.eup %1558  ;;  %v1085_v51 = vadd.f32 1.0, %v1557_v44  ;;  %1584 = vpow2.f32 %v1007_v37  ;;  %v1009_v52 = vmul.f32 1.442695, %v943_v42  ;;  %v846_v50 = vpop.f32.mrf.mxu0 }
 0x2a3   :  { %v1561_v54 = vpop.eup %1560  ;;  %1178 = vst [vmem:[#allocation2 + $0x8] sm:$0xff] %v1559_v49  ;;  %v1011_v58 = vmul.f32 1.442695, %v944_v46  ;;  %v945_v63 = vsub.f32 0.0, %v845_v47  ;;  %v847_v53 = vadd.f32 %v846_v50, %v2254_v19 }
 0x2a4   :  { %v1563_v57 = vpop.eup %1562  ;;  %1586 = vrcp.f32 %v1085_v51  ;;  %v1086_v59 = vadd.f32 1.0, %v1561_v54  ;;  %v850_v61 = vpop.f32.mrf.mxu0 }
 0x2a5   :  { %v1565_v2 = vpop.eup %1564  ;;  %1179 = vst [vmem:[#allocation2 + $0x10] sm:$0xff] %v1563_v57  ;;  %1588 = vpow2.f32 %v1009_v52  ;;  %v1013_v7 = vmul.f32 1.442695, %v945_v63  ;;  %v946_v10 = vsub.f32 0.0, %v847_v53  ;;  %v851_v14 = vadd.f32 %v850_v61, %v2252_v55 }
 0x2a6   :  { %v1567_v62 = vpop.eup %1566  ;;  %1590 = vrcp.f32 %v1086_v59  ;;  %v1087_v0 = vadd.f32 1.0, %v1565_v2  ;;  %v852_v3 = vpop.f32.mrf.mxu0 }
 0x2a7   :  { %v1569_v17 = vpop.eup %1568  ;;  %1180 = vst [vmem:[#allocation2 + $0x18] sm:$0xff] %v1567_v62  ;;  %1592 = vpow2.f32 %v1011_v58  ;;  %v1015_v22 = vmul.f32 1.442695, %v946_v10  ;;  %v947_v25 = vsub.f32 0.0, %v851_v14  ;;  %v853_v29 = vadd.f32 %v852_v3, %v2254_v19 }
 0x2a8   :  { %v1571_v4 = vpop.eup %1570  ;;  %1594 = vrcp.f32 %v1087_v0  ;;  %v1088_v6 = vadd.f32 1.0, %v1569_v17  ;;  %v854_v32 = vpop.f32.mrf.mxu0 }
 0x2a9   :  { %v1573_v38 = vpop.eup %1572  ;;  %1181 = vst [vmem:[#allocation2 + $0x20] sm:$0xff] %v1571_v4  ;;  %1596 = vpow2.f32 %v1013_v7  ;;  %v1017_v41 = vmul.f32 1.442695, %v947_v25  ;;  %v948_v45 = vsub.f32 0.0, %v853_v29  ;;  %v855_v9 = vadd.f32 %v854_v32, %v2252_v55 }
 0x2aa   :  { %v1575_v11 = vpop.eup %1574  ;;  %1598 = vrcp.f32 %v1088_v6  ;;  %v1089_v13 = vadd.f32 1.0, %v1573_v38  ;;  %v856_v15 = vpop.f32.mrf.mxu0 }
 0x2ab   :  { %v1577_v16 = vpop.eup %1576  ;;  %1182 = vst [vmem:[#allocation2 + $0x28] sm:$0xff] %v1575_v11  ;;  %1600 = vpow2.f32 %v1015_v22  ;;  %v1019_v48 = vmul.f32 1.442695, %v948_v45  ;;  %v949_v60 = vsub.f32 0.0, %v855_v9  ;;  %v857_v1 = vadd.f32 %v856_v15, %v2254_v19 }
 0x2ac   :  { %v1579_v8 = vpop.eup %1578  ;;  %1602 = vrcp.f32 %v1089_v13  ;;  %v1090_v18 = vadd.f32 1.0, %v1577_v16  ;;  %v860_v5 = vpop.f32.mrf.mxu0 }
 0x2ad   :  { %v1581_v12 = vpop.eup %1580  ;;  %1183 = vst [vmem:[#allocation2 + $0x30] sm:$0xff] %v1579_v8  ;;  %1604 = vpow2.f32 %v1017_v41  ;;  %v1021_v20 = vmul.f32 1.442695, %v949_v60  ;;  %v950_v21 = vsub.f32 0.0, %v857_v1  ;;  %v861_v56 = vadd.f32 %v860_v5, %v2252_v55 }
 0x2ae   :  { %v1583_v23 = vpop.eup %1582  ;;  %1606 = vrcp.f32 %v1090_v18  ;;  %v1091_v24 = vadd.f32 1.0, %v1581_v12  ;;  %v862_v26 = vpop.f32.mrf.mxu0 }
 0x2af   :  { %v1585_v27 = vpop.eup %1584  ;;  %1184 = vst [vmem:[#allocation2 + $0x38] sm:$0xff] %v1583_v23  ;;  %1608 = vpow2.f32 %v1019_v48  ;;  %v1023_v28 = vmul.f32 1.442695, %v950_v21  ;;  %v951_v36 = vsub.f32 0.0, %v861_v56  ;;  %v863_v30 = vadd.f32 %v862_v26, %v2254_v19 }
 0x2b0   :  { %1610 = vrcp.f32 %v1091_v24  ;;  %v1092_v31 = vadd.f32 1.0, %v1585_v27  ;;  %v864_v33 = vpop.f32.mrf.mxu0 }
 0x2b1   :  { %v1587_v34 = vpop.eup %1586  ;;  %1612 = vpow2.f32 %v1021_v20  ;;  %v1025_v35 = vmul.f32 1.442695, %v951_v36  ;;  %v952_v37 = vsub.f32 0.0, %v863_v30  ;;  %v865_v39 = vadd.f32 %v864_v33, %v2252_v55 }
 0x2b2   :  { %v1589_v40 = vpop.eup %1588  ;;  %1185 = vst [vmem:[#allocation2 + $0x40] sm:$0xff] %v1587_v34  ;;  %1614 = vrcp.f32 %v1092_v31  ;;  %v866_v42 = vpop.f32.mrf.mxu0 }
 0x2b3   :  { %v1591_v43 = vpop.eup %1590  ;;  %v1093_v44 = vadd.f32 1.0, %v1589_v40  ;;  %1616 = vpow2.f32 %v1023_v28  ;;  %v1027_v46 = vmul.f32 1.442695, %v952_v37  ;;  %v953_v47 = vsub.f32 0.0, %v865_v39 }
 0x2b4   :  { %v1593_v49 = vpop.eup %1592  ;;  %1186 = vst [vmem:[#allocation2 + $0x48] sm:$0xff] %v1591_v43  ;;  %1618 = vpow2.f32 %v1025_v35  ;;  %v867_v51 = vadd.f32 %v866_v42, %v2254_v19  ;;  %v870_v52 = vpop.f32.mrf.mxu0 }
 0x2b5   :  { %v1595_v50 = vpop.eup %1594  ;;  %1620 = vrcp.f32 %v1093_v44  ;;  %v1094_v54 = vadd.f32 1.0, %v1593_v49  ;;  %v1029_v58 = vmul.f32 1.442695, %v953_v47  ;;  %v871_v63 = vadd.f32 %v870_v52, %v2252_v55 }
 0x2b6   :  { %v1597_v53 = vpop.eup %1596  ;;  %1187 = vst [vmem:[#allocation2 + $0x50] sm:$0xff] %v1595_v50  ;;  %1622 = vpow2.f32 %v1027_v46  ;;  %v954_v57 = vsub.f32 0.0, %v867_v51  ;;  %v872_v59 = vpop.f32.mrf.mxu0 }
 0x2b7   :  { %v1599_v61 = vpop.eup %1598  ;;  %1624 = vrcp.f32 %v1094_v54  ;;  %v1095_v2 = vadd.f32 1.0, %v1597_v53  ;;  %v955_v7 = vsub.f32 0.0, %v871_v63  ;;  %v873_v10 = vadd.f32 %v872_v59, %v2254_v19 }
 0x2b8   :  { %v1601_v14 = vpop.eup %1600  ;;  %1188 = vst [vmem:[#allocation2 + $0x58] sm:$0xff] %v1599_v61  ;;  %1626 = vpow2.f32 %v1029_v58  ;;  %v1031_v62 = vmul.f32 1.442695, %v954_v57  ;;  %v874_v0 = vpop.f32.mrf.mxu0 }
 0x2b9   :  { %v1603_v3 = vpop.eup %1602  ;;  %1628 = vrcp.f32 %v1095_v2  ;;  %v1096_v17 = vadd.f32 1.0, %v1601_v14  ;;  %v1033_v22 = vmul.f32 1.442695, %v955_v7  ;;  %v956_v25 = vsub.f32 0.0, %v873_v10 }
 0x2ba   :  { %v1605_v29 = vpop.eup %1604  ;;  %1189 = vst [vmem:[#allocation2 + $0x60] sm:$0xff] %v1603_v3  ;;  %1630 = vpow2.f32 %v1031_v62  ;;  %v875_v4 = vadd.f32 %v874_v0, %v2252_v55  ;;  %v876_v6 = vpop.f32.mrf.mxu0 }
 0x2bb   :  { %v1607_v32 = vpop.eup %1606  ;;  %1632 = vrcp.f32 %v1096_v17  ;;  %v1097_v38 = vadd.f32 1.0, %v1605_v29  ;;  %v1035_v41 = vmul.f32 1.442695, %v956_v25  ;;  %v877_v45 = vadd.f32 %v876_v6, %v2254_v19 }
 0x2bc   :  { %v1609_v9 = vpop.eup %1608  ;;  %1190 = vst [vmem:[#allocation2 + $0x68] sm:$0xff] %v1607_v32  ;;  %1634 = vpow2.f32 %v1033_v22  ;;  %v957_v11 = vsub.f32 0.0, %v875_v4  ;;  %v880_v13 = vpop.f32.mrf.mxu0 }
 0x2bd   :  { %v1611_v15 = vpop.eup %1610  ;;  %1636 = vrcp.f32 %v1097_v38  ;;  %v1098_v16 = vadd.f32 1.0, %v1609_v9  ;;  %v958_v48 = vsub.f32 0.0, %v877_v45  ;;  %v881_v60 = vadd.f32 %v880_v13, %v2252_v55 }
 0x2be   :  { %v1613_v1 = vpop.eup %1612  ;;  %1191 = vst [vmem:[#allocation2 + $0x70] sm:$0xff] %v1611_v15  ;;  %1638 = vpow2.f32 %v1035_v41  ;;  %v1037_v8 = vmul.f32 1.442695, %v957_v11  ;;  %v882_v18 = vpop.f32.mrf.mxu0 }
 0x2bf   :  { %v1615_v5 = vpop.eup %1614  ;;  %1640 = vrcp.f32 %v1098_v16  ;;  %v1099_v12 = vadd.f32 1.0, %v1613_v1  ;;  %v1039_v20 = vmul.f32 1.442695, %v958_v48  ;;  %v959_v21 = vsub.f32 0.0, %v881_v60 }
 0x2c0   :  { %v1617_v56 = vpop.eup %1616  ;;  %1192 = vst [vmem:[#allocation2 + $0x78] sm:$0xff] %v1615_v5  ;;  %1642 = vpow2.f32 %v1037_v8  ;;  %v883_v23 = vadd.f32 %v882_v18, %v2254_v19  ;;  %v884_v24 = vpop.f32.mrf.mxu0 }
 0x2c1   :  { %v1619_v26 = vpop.eup %1618  ;;  %1644 = vrcp.f32 %v1099_v12  ;;  %v1100_v27 = vadd.f32 1.0, %v1617_v56  ;;  %v1041_v28 = vmul.f32 1.442695, %v959_v21  ;;  %v885_v36 = vadd.f32 %v884_v24, %v2252_v55 }
 0x2c2   :  { %v1621_v30 = vpop.eup %1620  ;;  %v1101_v31 = vadd.f32 1.0, %v1619_v26  ;;  %1646 = vpow2.f32 %v1039_v20  ;;  %v960_v33 = vsub.f32 0.0, %v883_v23  ;;  %v886_v34 = vpop.f32.mrf.mxu0 }
 0x2c3   :  { %v1623_v35 = vpop.eup %1622  ;;  %1193 = vst [vmem:[#allocation2 + $0x80] sm:$0xff] %v1621_v30  ;;  %1648 = vrcp.f32 %v1100_v27  ;;  %v961_v37 = vsub.f32 0.0, %v885_v36  ;;  %v887_v39 = vadd.f32 %v886_v34, %v2254_v19 }
 0x2c4   :  { %v1625_v40 = vpop.eup %1624  ;;  %1650 = vrcp.f32 %v1101_v31  ;;  %v1102_v42 = vadd.f32 1.0, %v1623_v35  ;;  %v1043_v43 = vmul.f32 1.442695, %v960_v33  ;;  %v890_v44 = vpop.f32.mrf.mxu0 }
 0x2c5   :  { %v1627_v46 = vpop.eup %1626  ;;  %1194 = vst [vmem:[#allocation2 + $0x88] sm:$0xff] %v1625_v40  ;;  %1652 = vpow2.f32 %v1041_v28  ;;  %v1045_v47 = vmul.f32 1.442695, %v961_v37  ;;  %v962_v49 = vsub.f32 0.0, %v887_v39  ;;  %v891_v51 = vadd.f32 %v890_v44, %v2252_v55 }
 0x2c6   :  { %v1629_v52 = vpop.eup %1628  ;;  %1654 = vrcp.f32 %v1102_v42  ;;  %v1103_v50 = vadd.f32 1.0, %v1627_v46  ;;  %v892_v54 = vpop.f32.mrf.mxu0 }
 0x2c7   :  { %v1631_v58 = vpop.eup %1630  ;;  %1195 = vst [vmem:[#allocation2 + $0x90] sm:$0xff] %v1629_v52  ;;  %1656 = vpow2.f32 %v1043_v43  ;;  %v1047_v63 = vmul.f32 1.442695, %v962_v49  ;;  %v963_v53 = vsub.f32 0.0, %v891_v51  ;;  %v893_v57 = vadd.f32 %v892_v54, %v2254_v19 }
 0x2c8   :  { %v1633_v59 = vpop.eup %1632  ;;  %1658 = vrcp.f32 %v1103_v50  ;;  %v1104_v61 = vadd.f32 1.0, %v1631_v58  ;;  %v894_v2 = vpop.f32.mrf.mxu0 }
 0x2c9   :  { %v1635_v7 = vpop.eup %1634  ;;  %1196 = vst [vmem:[#allocation2 + $0x98] sm:$0xff] %v1633_v59  ;;  %1660 = vpow2.f32 %v1045_v47  ;;  %v1049_v10 = vmul.f32 1.442695, %v963_v53  ;;  %v964_v14 = vsub.f32 0.0, %v893_v57  ;;  %v895_v62 = vadd.f32 %v894_v2, %v2252_v55 }
 0x2ca   :  { %v1637_v0 = vpop.eup %1636  ;;  %1662 = vrcp.f32 %v1104_v61  ;;  %v1105_v3 = vadd.f32 1.0, %v1635_v7  ;;  %v896_v17 = vpop.f32.mrf.mxu0 }
 0x2cb   :  { %v1639_v22 = vpop.eup %1638  ;;  %1197 = vst [vmem:[#allocation2 + $0xa0] sm:$0xff] %v1637_v0  ;;  %1664 = vpow2.f32 %v1047_v63  ;;  %v1051_v25 = vmul.f32 1.442695, %v964_v14  ;;  %v965_v29 = vsub.f32 0.0, %v895_v62  ;;  %v897_v4 = vadd.f32 %v896_v17, %v2254_v19 }
 0x2cc   :  { %v1641_v6 = vpop.eup %1640  ;;  %1666 = vrcp.f32 %v1105_v3  ;;  %v1106_v32 = vadd.f32 1.0, %v1639_v22  ;;  %v900_v38 = vpop.f32.mrf.mxu0 }
 0x2cd   :  { %v1643_v41 = vpop.eup %1642  ;;  %1198 = vst [vmem:[#allocation2 + $0xa8] sm:$0xff] %v1641_v6  ;;  %1668 = vpow2.f32 %v1049_v10  ;;  %v1053_v45 = vmul.f32 1.442695, %v965_v29  ;;  %v966_v9 = vsub.f32 0.0, %v897_v4  ;;  %v901_v11 = vadd.f32 %v900_v38, %v2252_v55 }
 0x2ce   :  { %v1645_v13 = vpop.eup %1644  ;;  %1670 = vrcp.f32 %v1106_v32  ;;  %v1107_v15 = vadd.f32 1.0, %v1643_v41  ;;  %v902_v16 = vpop.f32.mrf.mxu0 }
 0x2cf   :  { %v1647_v48 = vpop.eup %1646  ;;  %1199 = vst [vmem:[#allocation2 + $0xb0] sm:$0xff] %v1645_v13  ;;  %1672 = vpow2.f32 %v1051_v25  ;;  %v1055_v60 = vmul.f32 1.442695, %v966_v9  ;;  %v967_v1 = vsub.f32 0.0, %v901_v11  ;;  %v903_v8 = vadd.f32 %v902_v16, %v2254_v19 }
 0x2d0   :  { %v1649_v18 = vpop.eup %1648  ;;  %1674 = vrcp.f32 %v1107_v15  ;;  %v1108_v5 = vadd.f32 1.0, %v1647_v48  ;;  %v904_v12 = vpop.f32.mrf.mxu0 }
 0x2d1   :  { %v1651_v20 = vpop.eup %1650  ;;  %1200 = vst [vmem:[#allocation2 + $0xb8] sm:$0xff] %v1649_v18  ;;  %1676 = vpow2.f32 %v1053_v45  ;;  %v1057_v21 = vmul.f32 1.442695, %v967_v1  ;;  %v968_v56 = vsub.f32 0.0, %v903_v8  ;;  %v905_v23 = vadd.f32 %v904_v12, %v2252_v55 }
 0x2d2   :  { %v1653_v24 = vpop.eup %1652  ;;  %1201 = vst [vmem:[#allocation2 + $0xc0] sm:$0xff] %v1651_v20  ;;  %1678 = vrcp.f32 %v1108_v5  ;;  %v906_v26 = vpop.f32.mrf.mxu0 }
 0x2d3   :  { %v1655_v27 = vpop.eup %1654  ;;  %v1109_v28 = vadd.f32 1.0, %v1653_v24  ;;  %1680 = vpow2.f32 %v1055_v60  ;;  %v1059_v36 = vmul.f32 1.442695, %v968_v56  ;;  %v969_v30 = vsub.f32 0.0, %v905_v23 }
 0x2d4   :  { %v1657_v31 = vpop.eup %1656  ;;  %1202 = vst [vmem:[#allocation2 + $0xc8] sm:$0xff] %v1655_v27  ;;  %1682 = vpow2.f32 %v1057_v21  ;;  %v907_v33 = vadd.f32 %v906_v26, %v2254_v19  ;;  %v910_v34 = vpop.f32.mrf.mxu0 }
 0x2d5   :  { %v1659_v35 = vpop.eup %1658  ;;  %1684 = vrcp.f32 %v1109_v28  ;;  %v1110_v37 = vadd.f32 1.0, %v1657_v31  ;;  %v1061_v39 = vmul.f32 1.442695, %v969_v30  ;;  %v911_v40 = vadd.f32 %v910_v34, %v2252_v55 }
 0x2d6   :  { %v1661_v42 = vpop.eup %1660  ;;  %1203 = vst [vmem:[#allocation2 + $0xd0] sm:$0xff] %v1659_v35  ;;  %1686 = vpow2.f32 %v1059_v36  ;;  %v970_v43 = vsub.f32 0.0, %v907_v33  ;;  %v912_v44 = vpop.f32.mrf.mxu0 }
 0x2d7   :  { %v1663_v46 = vpop.eup %1662  ;;  %1688 = vrcp.f32 %v1110_v37  ;;  %v1111_v47 = vadd.f32 1.0, %v1661_v42  ;;  %v971_v49 = vsub.f32 0.0, %v911_v40  ;;  %v913_v51 = vadd.f32 %v912_v44, %v2254_v19 }
 0x2d8   :  { %v1665_v52 = vpop.eup %1664  ;;  %1204 = vst [vmem:[#allocation2 + $0xd8] sm:$0xff] %v1663_v46  ;;  %1690 = vpow2.f32 %v1061_v39  ;;  %v1063_v50 = vmul.f32 1.442695, %v970_v43  ;;  %v914_v54 = vpop.f32.mrf.mxu0 }
 0x2d9   :  { %v1667_v58 = vpop.eup %1666  ;;  %1692 = vrcp.f32 %v1111_v47  ;;  %v1112_v63 = vadd.f32 1.0, %v1665_v52  ;;  %v1065_v53 = vmul.f32 1.442695, %v971_v49  ;;  %v972_v57 = vsub.f32 0.0, %v913_v51 }
 0x2da   :  { %v1669_v59 = vpop.eup %1668  ;;  %1205 = vst [vmem:[#allocation2 + $0xe0] sm:$0xff] %v1667_v58  ;;  %1694 = vpow2.f32 %v1063_v50  ;;  %v915_v61 = vadd.f32 %v914_v54, %v2252_v55  ;;  %v916_v2 = vpop.f32.mrf.mxu0 }
 0x2db   :  { %v1671_v7 = vpop.eup %1670  ;;  %1696 = vrcp.f32 %v1112_v63  ;;  %v1113_v10 = vadd.f32 1.0, %v1669_v59  ;;  %v1067_v14 = vmul.f32 1.442695, %v972_v57  ;;  %v917_v62 = vadd.f32 %v916_v2, %v2254_v19 }
 0x2dc   :  { %v1673_v0 = vpop.eup %1672  ;;  %1206 = vst [vmem:[#allocation2 + $0xe8] sm:$0xff] %v1671_v7  ;;  %1698 = vpow2.f32 %v1065_v53  ;;  %v973_v3 = vsub.f32 0.0, %v915_v61  ;;  %v920_v17 = vpop.f32.mrf.mxu0 }
 0x2dd   :  { %v1675_v22 = vpop.eup %1674  ;;  %1700 = vrcp.f32 %v1113_v10  ;;  %v1114_v25 = vadd.f32 1.0, %v1673_v0  ;;  %v974_v29 = vsub.f32 0.0, %v917_v62  ;;  %v921_v4 = vadd.f32 %v920_v17, %v2252_v55 }
 0x2de   :  { %v1677_v6 = vpop.eup %1676  ;;  %1207 = vst [vmem:[#allocation2 + $0xf0] sm:$0xff] %v1675_v22  ;;  %1702 = vpow2.f32 %v1067_v14  ;;  %v1069_v32 = vmul.f32 1.442695, %v973_v3  ;;  %v922_v38 = vpop.f32.mrf.mxu0 }
 0x2df   :  { %v1679_v41 = vpop.eup %1678  ;;  %1704 = vrcp.f32 %v1114_v25  ;;  %v1115_v45 = vadd.f32 1.0, %v1677_v6  ;;  %v1071_v9 = vmul.f32 1.442695, %v974_v29  ;;  %v975_v11 = vsub.f32 0.0, %v921_v4 }
 0x2e0   :  { %v1681_v13 = vpop.eup %1680  ;;  %1208 = vst [vmem:[#allocation2 + $0xf8] sm:$0xff] %v1679_v41  ;;  %1706 = vpow2.f32 %v1069_v32  ;;  %v923_v15 = vadd.f32 %v922_v38, %v2254_v19  ;;  %v924_v16 = vpop.f32.mrf.mxu0 }
 0x2e1   :  { %v1683_v48 = vpop.eup %1682  ;;  %1708 = vrcp.f32 %v1115_v45  ;;  %v1116_v60 = vadd.f32 1.0, %v1681_v13  ;;  %v1073_v55 = vmul.f32 1.442695, %v975_v11 }
 0x2e2   :  { %v1685_v1 = vpop.eup %1684  ;;  %v1117_v8 = vadd.f32 1.0, %v1683_v48  ;;  %1710 = vpow2.f32 %v1071_v9  ;;  %v976_v18 = vsub.f32 0.0, %v923_v15  ;;  %v925_v5 = vpop.f32.mrf.mxu0 }
 0x2e3   :  { %v1687_v12 = vpop.eup %1686  ;;  %1209 = vst [vmem:[#allocation2 + $0x100] sm:$0xff] %v1685_v1  ;;  %1712 = vrcp.f32 %v1116_v60 }
 0x2e4   :  { %v1689_v20 = vpop.eup %1688  ;;  %1714 = vrcp.f32 %v1117_v8  ;;  %v1118_v21 = vadd.f32 1.0, %v1687_v12  ;;  %v1075_v56 = vmul.f32 1.442695, %v976_v18 }
 0x2e5   :  { %v1691_v23 = vpop.eup %1690  ;;  %1210 = vst [vmem:[#allocation2 + $0x108] sm:$0xff] %v1689_v20  ;;  %1716 = vpow2.f32 %v1073_v55 }
 0x2e6   :  { %v1693_v19 = vpop.eup %1692  ;;  %1718 = vrcp.f32 %v1118_v21  ;;  %v1119_v24 = vadd.f32 1.0, %v1691_v23 }
 0x2e7   :  { %v1695_v26 = vpop.eup %1694  ;;  %1211 = vst [vmem:[#allocation2 + $0x110] sm:$0xff] %v1693_v19  ;;  %1720 = vpow2.f32 %v1075_v56 }
 0x2e8   :  { %v1697_v27 = vpop.eup %1696  ;;  %1722 = vrcp.f32 %v1119_v24  ;;  %v1120_v28 = vadd.f32 1.0, %v1695_v26 }
 0x2e9   :  { %v1699_v36 = vpop.eup %1698  ;;  %1212 = vst [vmem:[#allocation2 + $0x118] sm:$0xff] %v1697_v27 }
 0x2ea   :  { %v1701_v30 = vpop.eup %1700  ;;  %1724 = vrcp.f32 %v1120_v28  ;;  %v1121_v31 = vadd.f32 1.0, %v1699_v36 }
 0x2eb   :  { %v1703_v33 = vpop.eup %1702  ;;  %1213 = vst [vmem:[#allocation2 + $0x120] sm:$0xff] %v1701_v30 }
 0x2ec   :  { %v1705_v34 = vpop.eup %1704  ;;  %1726 = vrcp.f32 %v1121_v31  ;;  %v1122_v35 = vadd.f32 1.0, %v1703_v33 }
 0x2ed   :  { %v1707_v37 = vpop.eup %1706  ;;  %1214 = vst [vmem:[#allocation2 + $0x128] sm:$0xff] %v1705_v34 }
 0x2ee   :  { %v1709_v39 = vpop.eup %1708  ;;  %1728 = vrcp.f32 %v1122_v35  ;;  %v1123_v40 = vadd.f32 1.0, %v1707_v37 }
 0x2ef   :  { %v1711_v42 = vpop.eup %1710  ;;  %1215 = vst [vmem:[#allocation2 + $0x130] sm:$0xff] %v1709_v39 }
 0x2f0   :  { %v1713_v43 = vpop.eup %1712  ;;  %1730 = vrcp.f32 %v1123_v40  ;;  %v1124_v44 = vadd.f32 1.0, %v1711_v42 }
 0x2f1   :  { %v1715_v46 = vpop.eup %1714  ;;  %1216 = vst [vmem:[#allocation2 + $0x138] sm:$0xff] %v1713_v43 }
 0x2f2   :  { %v1717_v47 = vpop.eup %1716  ;;  %1217 = vst [vmem:[#allocation2 + $0x140] sm:$0xff] %v1715_v46  ;;  %1732 = vrcp.f32 %v1124_v44 }
 0x2f3   :  { %v1719_v49 = vpop.eup %1718  ;;  %v1125_v51 = vadd.f32 1.0, %v1717_v47 }
 0x2f4   :  { %v1721_v52 = vpop.eup %1720  ;;  %1218 = vst [vmem:[#allocation2 + $0x148] sm:$0xff] %v1719_v49 }
 0x2f5   :  { %v1723_v50 = vpop.eup %1722  ;;  %1734 = vrcp.f32 %v1125_v51  ;;  %v1126_v54 = vadd.f32 1.0, %v1721_v52 }
 0x2f6   :  { %1219 = vst [vmem:[#allocation2 + $0x150] sm:$0xff] %v1723_v50 }
 0x2f7   :  { %v1725_v58 = vpop.eup %1724  ;;  %1736 = vrcp.f32 %v1126_v54 }
 0x2f8   :  { %1220 = vst [vmem:[#allocation2 + $0x158] sm:$0xff] %v1725_v58 }
 0x2f9   :  { %v1727_v63 = vpop.eup %1726 }
 0x2fa   :  { %1221 = vst [vmem:[#allocation2 + $0x160] sm:$0xff] %v1727_v63 }
 0x2fb   :  { %v1729_v53 = vpop.eup %1728 }
 0x2fc   :  { %1222 = vst [vmem:[#allocation2 + $0x168] sm:$0xff] %v1729_v53 }
 0x2fd   :  { %v1731_v57 = vpop.eup %1730 }
 0x2fe   :  { %1223 = vst [vmem:[#allocation2 + $0x170] sm:$0xff] %v1731_v57 }
 0x2ff   :  { %v1733_v59 = vpop.eup %1732 }
 0x300   :  { %1224 = vst [vmem:[#allocation2 + $0x178] sm:$0xff] %v1733_v59 }
 0x302   :  { %v1735_v61 = vpop.eup %1734 }
 0x303   :  { %1225 = vst [vmem:[#allocation2 + $0x180] sm:$0xff] %v1735_v61 }
 0x304   :  { %v1737_v2 = vpop.eup %1736 }
 0x305   :  { %1226 = vst [vmem:[#allocation2 + $0x188] sm:$0xff] %v1737_v2 }
 0x306   :  { %1749 = shalt.err (!%p1746_p4)
}
 0x307   :  { %s1764_s15 = smov 256   ;;  %s1765_s16 = smov 16  }
 0x308   :  { %1238 = dma.vmem_to_hbm [thread:$0]  %s1233_s13, 6400, %s2316_s7, [#allocation3], %s1764_s15, %s1764_s15, %s1765_s16  }
 0x309   :  { %1758 = dma.done.wait [#allocation3], 6400  }
 0x30a   :  { %1759 = vsyncadd [#allocation3], 4294960896 }
 0x30b   :  { %1242 = vsyncpa [#allocation3], 1 }

</bundles_post_ra>
